<compile_context>
chip_gen: v5e
topology: v5e:2x2
jax: 0.10.0
libtpu: 0.0.40
codegen_flags: <defaults>
</compile_context>

<pallas_src>
import functools
import math

import jax
import jax.numpy as jnp
from jax.experimental import pallas as pl
from jax.experimental.pallas import tpu as pltpu


# ----------------------------- in-kernel helpers -----------------------------

def _layernorm(x, g, b, eps=1e-5):
    mu = jnp.mean(x, axis=-1, keepdims=True)
    xc = x - mu
    var = jnp.mean(xc * xc, axis=-1, keepdims=True)
    return xc * jax.lax.rsqrt(var + eps) * g + b


def _softmax_over_seq(x):
    # softmax over the sequence axis (axis=1) of a (TB, N, H) tensor.
    m = jnp.max(x, axis=1, keepdims=True)
    e = jnp.exp(x - m)
    return e * pl.reciprocal(jnp.sum(e, axis=1, keepdims=True), approx=True)


def _gelu(x):
    return 0.5 * x * (1.0 + jnp.tanh(0.7978845608028654 * (x + 0.044715 * x * x * x)))


def _mm(a, w):
    # MXU matmul with f32 accumulation; activations cast to the weight storage
    # dtype (no-op for f32, bf16 feed for bf16 weights).
    return jnp.dot(a.astype(w.dtype), w, preferred_element_type=jnp.float32)


# --------------------------------- fused kernel --------------------------------

def fused_encoder_kernel(
    # input activations
    x_ref,
    # shared constants (resident): rotary tables, tied attn-logit weights, head mask
    c_ref, sn_ref, sp_ref, wqb_ref, wkb_ref, e_ref,
    # per-layer params (stacked on leading depth axis, block = 1)
    sm_ref, b1_ref, wq_ref, wk_ref, wv_ref, wro_ref, wo_ref, w1_ref, w2_ref,
    # output + residual-stream scratch
    o_ref, x_vmem,
    *, scale, shift,
):
    layer = pl.program_id(1)
    TB, N, D = x_ref.shape
    M = TB * N
    inner = wq_ref.shape[2]
    H = wqb_ref.shape[1]

    @pl.when(layer == 0)
    def _():
        x_vmem[...] = x_ref[...].reshape(M, D).astype(jnp.float32)

    x = x_vmem[...]                                   # (M, D) f32 residual stream

    sm = sm_ref[0]                                    # (6, D) f32 small per-layer params
    a_g, a_b = sm[0:1], sm[1:2]
    f_g, f_b = sm[2:3], sm[3:4]
    bro, b2 = sm[4:5], sm[5:6]

    # ---------------- attention block: x = x + FastAttention(LN(x)) ------------
    xn = _layernorm(x, a_g, a_b)
    q = _mm(xn, wq_ref[0])                            # (M, inner), permuted head layout
    k = _mm(xn, wk_ref[0])
    v = _mm(xn, wv_ref[0])

    C = c_ref[...]                                    # (N, inner)
    Sn = sn_ref[...]
    Sp = sp_ref[...]

    def rope(t):
        # de-interleaved rotary: t*cos + (within-head half-roll)*sin.  Lands on
        # XLU (roll) + VPU (mul/add); no MXU work.  Wrapped lanes only ever
        # multiply a zero sin entry.
        r_neg = pltpu.roll(t, inner - shift, axis=1)  # -> t[:, lane + shift]
        r_pos = pltpu.roll(t, shift, axis=1)          # -> t[:, lane - shift]
        t3 = t.reshape(TB, N, inner)
        return (t3 * C
                + r_neg.reshape(TB, N, inner) * Sn
                + r_pos.reshape(TB, N, inner) * Sp)

    q_aggr = rope(q)                                  # (TB, N, inner)
    k_aggr = rope(k)
    v_aggr = rope(v)

    E = e_ref[...]                                    # (H, inner) 0/1 head mask

    # global query: per-sequence softmax over N, then contract over N on MXU.
    q_logits = (_mm(q, wqb_ref[...]) * scale).reshape(TB, N, H)
    q_attn = _softmax_over_seq(q_logits)
    gq = jnp.einsum('bnh,bnf->bhf', q_attn, q_aggr,
                    preferred_element_type=jnp.float32)       # (TB, H, inner)
    global_q = jnp.sum(gq * E, axis=1, keepdims=True)         # (TB, 1, inner)

    # global key: '(d r)->d' pair-sum is folded into wkb's expanded rows.
    k_mod = (k.reshape(TB, N, inner) * global_q).reshape(M, inner)
    k_logits = (_mm(k_mod, wkb_ref[...]) * scale).reshape(TB, N, H)
    k_attn = _softmax_over_seq(k_logits)
    gk = jnp.einsum('bnh,bnf->bhf', k_attn, k_aggr,
                    preferred_element_type=jnp.float32)
    global_k = jnp.sum(gk * E, axis=1, keepdims=True)

    # value aggregation; to_r (with pair-sum) folded into to_out: wro = Wr @ wo.
    u = (v_aggr * global_k).reshape(M, inner)
    attn_out = _mm(u, wro_ref[0]) + _mm(q, wo_ref[0]) + bro    # (M, D)
    x = x + attn_out

    # ---------------- feed-forward block: x = x + FF(LN(x)) --------------------
    xn2 = _layernorm(x, f_g, f_b)
    h = _gelu(_mm(xn2, w1_ref[0]) + b1_ref[0])
    x = x + _mm(h, w2_ref[0]) + b2

    x_vmem[...] = x

    @pl.when(layer == pl.num_programs(1) - 1)
    def _():
        o_ref[...] = x.reshape(TB, N, D).astype(o_ref.dtype)


def logits_head_kernel(x_ref, g_ref, b_ref, wl_ref, bl_ref, o_ref):
    TB, N, D = x_ref.shape
    x = x_ref[...].reshape(TB * N, D).astype(jnp.float32)
    xn = _layernorm(x, g_ref[...], b_ref[...])
    logits = _mm(xn, wl_ref[...]) + bl_ref[...]
    o_ref[...] = logits.reshape(o_ref.shape).astype(o_ref.dtype)


# --------------------------------- wrappers -------------------------------------

def _vmem_limit_bytes(blocks, extra_bytes):
    # double-buffered pipeline blocks + scratch + allowance for f32 temporaries.
    est = sum(2 * math.prod(s) * jnp.dtype(d).itemsize for s, d in blocks)
    est = int(1.5 * (est + extra_bytes)) + (4 << 20)
    # clamp: floor well below any chip's budget; ceiling stays under v5e/v6e
    # (128 MiB).  At sizes that would exceed ~48 MiB, v7x (64 MiB) additionally
    # needs the N-tiling TODO above.
    return int(min(max(est, 16 << 20), 100 << 20))


def _encoder_embeddings(x, shared, layers, *, batch_block):
    B, N, D = x.shape
    depth = layers[0].shape[0]
    TB = batch_block
    assert B % TB == 0, "batch must be divisible by batch_block"
    assert TB == 1 or N % 8 == 0, "batch tiling (batch_block>1) needs N % 8 == 0"

    C, Sn, Sp, Wqb, Wkb, E = shared
    assert C.shape[0] >= N, "sequence longer than max_seq_len used for packing"
    shared_n = (C[:N], Sn[:N], Sp[:N], Wqb, Wkb, E)

    inner, H = Wqb.shape
    dh = inner // H
    scale = dh ** -0.5
    shift = dh // 4                        # within-head half-rotation roll distance
    dff = layers[7].shape[2]

    kernel = functools.partial(fused_encoder_kernel, scale=scale, shift=shift)

    in_specs = [pl.BlockSpec((TB, N, D), lambda b, l: (b, 0, 0))]
    in_specs += [pl.BlockSpec(a.shape, lambda b, l: (0, 0)) for a in shared_n]
    in_specs += [pl.BlockSpec((1,) + a.shape[1:], lambda b, l: (l, 0, 0))
                 for a in layers]
    out_specs = pl.BlockSpec((TB, N, D), lambda b, l: (b, 0, 0))

    blocks = [((TB, N, D), x.dtype), ((TB, N, D), x.dtype)]
    blocks += [(a.shape, a.dtype) for a in shared_n]
    blocks += [((1,) + a.shape[1:], a.dtype) for a in layers]
    work = 4 * TB * N * (10 * inner + dff + 6 * D)     # in-kernel f32 temporaries
    vlim = _vmem_limit_bytes(blocks, TB * N * D * 4 + work)

    return pl.pallas_call(
        kernel,
        out_shape=jax.ShapeDtypeStruct((B, N, D), x.dtype),
        grid=(B // TB, depth),
        in_specs=in_specs,
        out_specs=out_specs,
        scratch_shapes=[pltpu.VMEM((TB * N, D), jnp.float32)],
        compiler_params=pltpu.CompilerParams(
            dimension_semantics=("parallel", "arbitrary"),
            vmem_limit_bytes=vlim),
    )(x, *shared_n, *layers)


def _logits_head(emb, head, *, num_tokens, batch_block):
    B, N, D = emb.shape
    h_g, h_b, wl_pad, bl_pad = head
    Vp = wl_pad.shape[1]
    TB = batch_block
    TV = min(Vp, 512)
    while Vp % TV:
        TV //= 2

    blocks = [((TB, N, D), emb.dtype), (h_g.shape, h_g.dtype), (h_b.shape, h_b.dtype),
              ((D, TV), wl_pad.dtype), ((1, TV), bl_pad.dtype), ((TB, N, TV), emb.dtype)]
    vlim = _vmem_limit_bytes(blocks, 4 * TB * N * (D + TV))

    out = pl.pallas_call(
        logits_head_kernel,
        out_shape=jax.ShapeDtypeStruct((B, N, Vp), emb.dtype),
        grid=(B // TB, Vp // TV),
        in_specs=[pl.BlockSpec((TB, N, D), lambda b, v: (b, 0, 0)),
                  pl.BlockSpec(h_g.shape, lambda b, v: (0, 0)),
                  pl.BlockSpec(h_b.shape, lambda b, v: (0, 0)),
                  pl.BlockSpec((D, TV), lambda b, v: (0, v)),
                  pl.BlockSpec((1, TV), lambda b, v: (0, v))],
        out_specs=pl.BlockSpec((TB, N, TV), lambda b, v: (b, 0, v)),
        compiler_params=pltpu.CompilerParams(
            dimension_semantics=("parallel", "parallel"),
            vmem_limit_bytes=vlim),
    )(emb, h_g, h_b, wl_pad, bl_pad)
    return out[..., :num_tokens]


def _fused_forward(x, packed, *, num_tokens, return_embeddings=False, batch_block=None):
    B = x.shape[0]
    if batch_block is None:
        # >=2 parallel batch tiles when possible (v7x megacore) while still
        # amortizing per-layer weight DMA over the batch tile.
        batch_block = B // 2 if (B % 2 == 0 and B >= 2) else 1
    emb = _encoder_embeddings(x, packed["shared"], packed["layers"],
                              batch_block=batch_block)
    if return_embeddings:
        return emb
    return _logits_head(emb, packed["head"], num_tokens=num_tokens,
                        batch_block=batch_block)


fast_encoder_forward = jax.jit(
    _fused_forward,
    static_argnames=("num_tokens", "return_embeddings", "batch_block"))


# ----------------------------- parameter / const setup ------------------------

def pack_params(params, *, max_seq_len, heads, dim_head, param_dtype=jnp.float32):
    """Build kernel-ready, head-batched / layer-stacked tensors.

    Lane layout inside `inner = heads*dim_head` is head-major with a per-head
    de-interleave of the rotary lanes (even, odd, pass-through) so rotation is
    a lane roll.  Matmul weights are stored in `param_dtype` (bf16 recommended,
    MXU-native); LayerNorm / bias / table tensors stay f32.
    """
    dh, H = dim_head, heads
    assert dh % 4 == 0, "dim_head must be divisible by 4 for rotary embeddings"
    inner = H * dh
    rot = dh // 2                         # RotaryEmbedding(dim_head // 2)
    s = rot // 2                          # per-head roll shift
    wdt = param_dtype

    # within-head permutation: new position p  <-  original position orig[p]
    p = jnp.arange(dh)
    orig = jnp.where(p < s, 2 * p, jnp.where(p < rot, 2 * (p - s) + 1, p))
    col_perm = (jnp.arange(H)[:, None] * dh + orig[None, :]).reshape(-1)  # (inner,)

    # rotary tables (lucidrains convention: freqs concatenated, rotation pairwise)
    inv_freq = 1.0 / (10000.0 ** (jnp.arange(0, rot, 2, dtype=jnp.float32) / rot))
    t = jnp.arange(max_seq_len, dtype=jnp.float32)
    freqs = t[:, None] * inv_freq[None, :]
    freqs = jnp.concatenate([freqs, freqs], axis=-1)                      # (n, rot)
    cos_o = jnp.concatenate([jnp.cos(freqs),
                             jnp.ones((max_seq_len, dh - rot), jnp.float32)], -1)
    sin_o = jnp.concatenate([jnp.sin(freqs),
                             jnp.zeros((max_seq_len, dh - rot), jnp.float32)], -1)
    C_h = cos_o[:, orig]
    S_h = sin_o[:, orig]
    Sn_h = jnp.where(p[None, :] < s, -S_h, 0.0)
    Sp_h = jnp.where((p[None, :] >= s) & (p[None, :] < rot), S_h, 0.0)
    C = jnp.tile(C_h, (1, H))                                             # (n, inner)
    Sn = jnp.tile(Sn_h, (1, H))
    Sp = jnp.tile(Sp_h, (1, H))

    eye_h = jnp.eye(H, dtype=jnp.float32)
    wq_logit, wk_logit = params["shared"]                 # (dh,1), (dh//2,1), tied
    Wq_blk = jnp.kron(eye_h, wq_logit[orig, :]).astype(wdt)        # (inner, H)
    Wk_blk = jnp.kron(eye_h, wk_logit[orig // 2, :]).astype(wdt)   # pair-sum folded
    E_mask = jnp.kron(eye_h, jnp.ones((1, dh), jnp.float32))       # (H, inner)
    shared = (C, Sn, Sp, Wq_blk, Wk_blk, E_mask)

    smalls_l, b1_l = [], []
    wq_l, wk_l, wv_l, wro_l, wo_l, w1_l, w2_l = [], [], [], [], [], [], []
    for attn_p, ff_p in params["layers"]:
        a_g, a_b, wqkv, wr, br, wo, bo = attn_p
        f_g, f_b, w1, b1, w2, b2 = ff_p
        wq_l.append(wqkv[:, 0 * inner:1 * inner][:, col_perm])
        wk_l.append(wqkv[:, 1 * inner:2 * inner][:, col_perm])
        wv_l.append(wqkv[:, 2 * inner:3 * inner][:, col_perm])
        wo_perm = wo[col_perm, :]
        wr_head = wr[orig // 2, :][:, orig]               # (dh, dh) pair-sum + layout fold
        wro = jnp.kron(eye_h, wr_head) @ wo_perm          # to_r folded into to_out, (inner, D)
        bro = jnp.tile(br[:, orig], (1, H)) @ wo_perm + bo            # (1, D)
        wro_l.append(wro)
        wo_l.append(wo_perm)
        w1_l.append(w1)
        w2_l.append(w2)
        b1_l.append(b1)
        smalls_l.append(jnp.concatenate([a_g, a_b, f_g, f_b, bro, b2], axis=0))  # (6, D)

    def st(lst, dt):
        return jnp.stack(lst, axis=0).astype(dt)

    layers = (st(smalls_l, jnp.float32), st(b1_l, jnp.float32),
              st(wq_l, wdt), st(wk_l, wdt), st(wv_l, wdt),
              st(wro_l, wdt), st(wo_l, wdt), st(w1_l, wdt), st(w2_l, wdt))

    h_g, h_b, wl, bl = params["head"]
    num_tokens = wl.shape[-1]
    vpad = -(-num_tokens // 128) * 128                    # lane-dense logits store
    wl_pad = jnp.zeros((wl.shape[0], vpad), jnp.float32).at[:, :num_tokens].set(wl).astype(wdt)
    bl_pad = jnp.zeros((1, vpad), jnp.float32).at[:, :num_tokens].set(bl)
    head = (h_g.astype(jnp.float32), h_b.astype(jnp.float32), wl_pad, bl_pad)

    return {"shared": shared, "layers": layers, "head": head}


def linear_init(key, fan_in, fan_out, bias=True):
    k1, k2 = jax.random.split(key)
    lim = 1.0 / (fan_in ** 0.5)
    w = jax.random.uniform(k1, (fan_in, fan_out), jnp.float32, -lim, lim)
    if not bias:
        return w
    b = jax.random.uniform(k2, (1, fan_out), jnp.float32, -lim, lim)
    return w, b


def init_params(key, *, dim, depth, heads, dim_head, ff_mult, num_tokens):
    inner = heads * dim_head
    dim_kvproj = dim_head // 2            # rotary pos emb present
    keys = jax.random.split(key, 4 + depth * 6)   # generous key budget
    ki = iter(keys)

    # attn-logit projections shared across all layers (FastEncoder ties them)
    wq_logit = linear_init(next(ki), dim_head, 1, bias=False)        # (dh, 1)
    wk_logit = linear_init(next(ki), dim_kvproj, 1, bias=False)      # (dh//2, 1)

    layers = []
    for _ in range(depth):
        a_ln_g = jnp.ones((1, dim), jnp.float32)
        a_ln_b = jnp.zeros((1, dim), jnp.float32)
        wqkv = linear_init(next(ki), dim, inner * 3, bias=False)
        wr, br = linear_init(next(ki), dim_kvproj, dim_head)
        wo, bo = linear_init(next(ki), inner, dim)
        attn_p = (a_ln_g, a_ln_b, wqkv, wr, br, wo, bo)

        f_ln_g = jnp.ones((1, dim), jnp.float32)
        f_ln_b = jnp.zeros((1, dim), jnp.float32)
        w1, b1 = linear_init(next(ki), dim, dim * ff_mult)
        w2, b2 = linear_init(next(ki), dim * ff_mult, dim)
        ff_p = (f_ln_g, f_ln_b, w1, b1, w2, b2)
        layers.append((attn_p, ff_p))

    h_ln_g = jnp.ones((1, dim), jnp.float32)
    h_ln_b = jnp.zeros((1, dim), jnp.float32)
    wl, bl = linear_init(next(ki), dim, num_tokens)
    head_p = (h_ln_g, h_ln_b, wl, bl)

    return {"shared": (wq_logit, wk_logit), "layers": layers, "head": head_p}


# ----------------------------- pure-JAX reference ------------------------------

def reference_forward(x, params, *, heads, dim_head, max_seq_len, return_embeddings=False):
    """Direct transcription of the PyTorch FastEncoder forward (mask=None)."""
    B, N, D = x.shape
    h, dh = heads, dim_head
    rot = dh // 2
    scale = dh ** -0.5

    inv_freq = 1.0 / (10000.0 ** (jnp.arange(0, rot, 2, dtype=jnp.float32) / rot))
    t = jnp.arange(max_seq_len, dtype=jnp.float32)
    freqs = t[:, None] * inv_freq[None, :]
    freqs = jnp.concatenate([freqs, freqs], axis=-1)[:N]       # (N, rot)
    cosf, sinf = jnp.cos(freqs), jnp.sin(freqs)

    def rotate_every_two(z):
        z1, z2 = z[..., 0::2], z[..., 1::2]
        return jnp.stack([-z2, z1], axis=-1).reshape(z.shape)

    def apply_rot(z):                                          # z: (B, h, N, dh)
        zr, zp = z[..., :rot], z[..., rot:]
        zr = zr * cosf + rotate_every_two(zr) * sinf
        return jnp.concatenate([zr, zp], axis=-1)

    def layernorm(z, g, b, eps=1e-5):
        mu = jnp.mean(z, axis=-1, keepdims=True)
        var = jnp.mean((z - mu) ** 2, axis=-1, keepdims=True)
        return (z - mu) * jax.lax.rsqrt(var + eps) * g + b

    def gelu_tanh(z):
        return 0.5 * z * (1.0 + jnp.tanh(0.7978845608028654 * (z + 0.044715 * z ** 3)))

    wq_logit, wk_logit = params["shared"]
    for attn_p, ff_p in params["layers"]:
        a_g, a_b, wqkv, wr, br, wo, bo = attn_p
        f_g, f_b, w1, b1, w2, b2 = ff_p

        xn = layernorm(x, a_g, a_b)
        q, k, v = jnp.split(xn @ wqkv, 3, axis=-1)

        def heads_first(z):
            return z.reshape(B, N, h, dh).transpose(0, 2, 1, 3)
        q, k, v = heads_first(q), heads_first(k), heads_first(v)

        q_aggr, k_aggr, v_aggr = apply_rot(q), apply_rot(k), apply_rot(v)

        q_logits = jnp.einsum('bhnd,d->bhn', q, wq_logit[:, 0]) * scale
        q_attn = jax.nn.softmax(q_logits, axis=-1)
        global_q = jnp.einsum('bhn,bhnd->bhd', q_attn, q_aggr)[:, :, None, :]

        k_mod = k * global_q
        k_red = k_mod.reshape(B, h, N, dh // 2, 2).sum(-1)
        k_logits = jnp.einsum('bhnd,d->bhn', k_red, wk_logit[:, 0]) * scale
        k_attn = jax.nn.softmax(k_logits, axis=-1)
        global_k = jnp.einsum('bhn,bhnd->bhd', k_attn, k_aggr)[:, :, None, :]

        u = v_aggr * global_k
        u_red = u.reshape(B, h, N, dh // 2, 2).sum(-1)
        r = u_red @ wr + br + q                                # (B, h, N, dh)
        r = r.transpose(0, 2, 1, 3).reshape(B, N, h * dh)
        x = x + r @ wo + bo

        xn2 = layernorm(x, f_g, f_b)
        x = x + gelu_tanh(xn2 @ w1 + b1) @ w2 + b2

    if return_embeddings:
        return x
    h_g, h_b, wl, bl = params["head"]
    return layernorm(x, h_g, h_b) @ wl + bl


# ----------------------------------- main --------------------------------------

if __name__ == "__main__":
    B, N = 2, 8
    dim = 32
    depth = 2
    heads = 2
    dim_head = 16            # divisible by 4 (rotary requirement)
    ff_mult = 4
    num_tokens = 11
    max_seq_len = 16         # N <= max_seq_len

    key = jax.random.PRNGKey(0)
    k_params, k_x = jax.random.split(key)
    params = init_params(k_params, dim=dim, depth=depth, heads=heads,
                         dim_head=dim_head, ff_mult=ff_mult, num_tokens=num_tokens)

    # FastEncoder.forward takes already-embedded features x of shape (B, N, dim)
    x = jax.random.normal(k_x, (B, N, dim), jnp.float32)

    ref = reference_forward(x, params, heads=heads, dim_head=dim_head,
                            max_seq_len=max_seq_len)

    # f32 weights, batch_block=1: parity with the reference forward.
    packed32 = pack_params(params, max_seq_len=max_seq_len, heads=heads,
                           dim_head=dim_head, param_dtype=jnp.float32)
    out32 = fast_encoder_forward(x, packed32, num_tokens=num_tokens, batch_block=1)
    jax.block_until_ready(out32)
    assert out32.shape == (B, N, num_tokens), out32.shape
    err32 = float(jnp.max(jnp.abs(out32 - ref)))
    assert err32 < 1e-1, f"f32 kernel mismatch vs reference: {err32}"

    # bf16 weights (MXU-native), batch-tiled: performance configuration.
    packed16 = pack_params(params, max_seq_len=max_seq_len, heads=heads,
                           dim_head=dim_head, param_dtype=jnp.bfloat16)
    out16 = fast_encoder_forward(x, packed16, num_tokens=num_tokens, batch_block=2)
    jax.block_until_ready(out16)
    assert out16.shape == (B, N, num_tokens), out16.shape
    assert bool(jnp.all(jnp.isfinite(out16)))
    err16 = float(jnp.max(jnp.abs(out16 - ref)))
    assert err16 < 0.5, f"bf16 kernel drifted too far from reference: {err16}"

    print("KERNEL_OK")
</pallas_src>

<mosaic_0001>
module attributes {stable_mosaic.version = 11 : i64} {
  func.func @fused_encoder_kernel(%arg0: i32, %arg1: i32, %arg2: memref<1x8x32xf32, #tpu.memory_space<vmem>>, %arg3: memref<8x32xf32, #tpu.memory_space<vmem>>, %arg4: memref<8x32xf32, #tpu.memory_space<vmem>>, %arg5: memref<8x32xf32, #tpu.memory_space<vmem>>, %arg6: memref<32x2xf32, #tpu.memory_space<vmem>>, %arg7: memref<32x2xf32, #tpu.memory_space<vmem>>, %arg8: memref<2x32xf32, #tpu.memory_space<vmem>>, %arg9: memref<1x6x32xf32, #tpu.memory_space<vmem>>, %arg10: memref<1x1x128xf32, #tpu.memory_space<vmem>>, %arg11: memref<1x32x32xf32, #tpu.memory_space<vmem>>, %arg12: memref<1x32x32xf32, #tpu.memory_space<vmem>>, %arg13: memref<1x32x32xf32, #tpu.memory_space<vmem>>, %arg14: memref<1x32x32xf32, #tpu.memory_space<vmem>>, %arg15: memref<1x32x32xf32, #tpu.memory_space<vmem>>, %arg16: memref<1x32x128xf32, #tpu.memory_space<vmem>>, %arg17: memref<1x128x32xf32, #tpu.memory_space<vmem>>, %arg18: memref<1x8x32xf32, #tpu.memory_space<vmem>>, %arg19: memref<8x32xf32, #tpu.memory_space<vmem>>) attributes {dimension_semantics = [#tpu.dimension_semantics<parallel>, #tpu.dimension_semantics<arbitrary>], iteration_bounds = array<i64: 2, 2>, scalar_prefetch = 0 : i64, scratch_operands = 1 : i64, tpu.core_type = #tpu.core_type<tc>, window_params = [{transform_indices = @transform_0, window_bounds = array<i64: 1, 8, 32>}, {pipeline_mode = #tpu.pipeline_mode<synchronous>, transform_indices = @transform_1, window_bounds = array<i64: 8, 32>}, {pipeline_mode = #tpu.pipeline_mode<synchronous>, transform_indices = @transform_2, window_bounds = array<i64: 8, 32>}, {pipeline_mode = #tpu.pipeline_mode<synchronous>, transform_indices = @transform_3, window_bounds = array<i64: 8, 32>}, {pipeline_mode = #tpu.pipeline_mode<synchronous>, transform_indices = @transform_4, window_bounds = array<i64: 32, 2>}, {pipeline_mode = #tpu.pipeline_mode<synchronous>, transform_indices = @transform_5, window_bounds = array<i64: 32, 2>}, {pipeline_mode = #tpu.pipeline_mode<synchronous>, transform_indices = @transform_6, window_bounds = array<i64: 2, 32>}, {transform_indices = @transform_7, window_bounds = array<i64: 1, 6, 32>}, {transform_indices = @transform_8, window_bounds = array<i64: 1, 1, 128>}, {transform_indices = @transform_9, window_bounds = array<i64: 1, 32, 32>}, {transform_indices = @transform_10, window_bounds = array<i64: 1, 32, 32>}, {transform_indices = @transform_11, window_bounds = array<i64: 1, 32, 32>}, {transform_indices = @transform_12, window_bounds = array<i64: 1, 32, 32>}, {transform_indices = @transform_13, window_bounds = array<i64: 1, 32, 32>}, {transform_indices = @transform_14, window_bounds = array<i64: 1, 32, 128>}, {transform_indices = @transform_15, window_bounds = array<i64: 1, 128, 32>}, {transform_indices = @transform_16, window_bounds = array<i64: 1, 8, 32>}]} {
    %c0_i32 = arith.constant 0 : i32
    %0 = arith.cmpi eq, %arg1, %c0_i32 : i32
    %1 = arith.extui %0 : i1 to i32
    %c0_i32_0 = arith.constant 0 : i32
    %2 = arith.cmpi ne, %1, %c0_i32_0 : i32
    scf.if %2 {
      %c0_80 = arith.constant 0 : index
      %c0_81 = arith.constant 0 : index
      %c0_82 = arith.constant 0 : index
      %191 = vector.load %arg2[%c0_80, %c0_81, %c0_82] : memref<1x8x32xf32, #tpu.memory_space<vmem>>, vector<1x8x32xf32>
      %192 = vector.shape_cast %191 : vector<1x8x32xf32> to vector<8x32xf32>
      %c0_83 = arith.constant 0 : index
      %c0_84 = arith.constant 0 : index
      %193 = vector.load %arg19[%c0_83, %c0_84] : memref<8x32xf32, #tpu.memory_space<vmem>>, vector<8x32xf32>
      tpu.vector_store %arg19[%c0_83, %c0_84], %192 {strides = array<i32>} : memref<8x32xf32, #tpu.memory_space<vmem>>, vector<8x32xf32>,
    } else {
    }
    %c0 = arith.constant 0 : index
    %c0_1 = arith.constant 0 : index
    %3 = vector.load %arg19[%c0, %c0_1] : memref<8x32xf32, #tpu.memory_space<vmem>>, vector<8x32xf32>
    %c0_2 = arith.constant 0 : index
    %c0_3 = arith.constant 0 : index
    %c0_4 = arith.constant 0 : index
    %4 = vector.load %arg9[%c0_2, %c0_3, %c0_4] : memref<1x6x32xf32, #tpu.memory_space<vmem>>, vector<1x6x32xf32>
    %5 = vector.shape_cast %4 : vector<1x6x32xf32> to vector<6x32xf32>
    %6 = vector.extract_strided_slice %5 {offsets = [0, 0], sizes = [1, 32], strides = [1, 1]} : vector<6x32xf32> to vector<1x32xf32>
    %7 = vector.extract_strided_slice %5 {offsets = [1, 0], sizes = [1, 32], strides = [1, 1]} : vector<6x32xf32> to vector<1x32xf32>
    %8 = vector.extract_strided_slice %5 {offsets = [2, 0], sizes = [1, 32], strides = [1, 1]} : vector<6x32xf32> to vector<1x32xf32>
    %9 = vector.extract_strided_slice %5 {offsets = [3, 0], sizes = [1, 32], strides = [1, 1]} : vector<6x32xf32> to vector<1x32xf32>
    %10 = vector.extract_strided_slice %5 {offsets = [4, 0], sizes = [1, 32], strides = [1, 1]} : vector<6x32xf32> to vector<1x32xf32>
    %11 = vector.extract_strided_slice %5 {offsets = [5, 0], sizes = [1, 32], strides = [1, 1]} : vector<6x32xf32> to vector<1x32xf32>
    %cst = arith.constant dense<0.000000e+00> : vector<8xf32>
    %12 = vector.multi_reduction <add>, %3, %cst [1] : vector<8x32xf32> to vector<8xf32>
    %13 = vector.shape_cast %12 : vector<8xf32> to vector<8x1xf32>
    %cst_5 = arith.constant 3.200000e+01 : f32
    %14 = vector.broadcast %cst_5 : f32 to vector<8x1xf32>
    %15 = arith.divf %13, %14 : vector<8x1xf32>
    %16 = vector.broadcast %15 : vector<8x1xf32> to vector<8x32xf32>
    %17 = arith.subf %3, %16 : vector<8x32xf32>
    %18 = arith.mulf %17, %17 : vector<8x32xf32>
    %cst_6 = arith.constant dense<0.000000e+00> : vector<8xf32>
    %19 = vector.multi_reduction <add>, %18, %cst_6 [1] : vector<8x32xf32> to vector<8xf32>
    %20 = vector.shape_cast %19 : vector<8xf32> to vector<8x1xf32>
    %cst_7 = arith.constant 3.200000e+01 : f32
    %21 = vector.broadcast %cst_7 : f32 to vector<8x1xf32>
    %22 = arith.divf %20, %21 : vector<8x1xf32>
    %cst_8 = arith.constant 9.99999974E-6 : f32
    %23 = vector.broadcast %cst_8 : f32 to vector<8x1xf32>
    %24 = arith.addf %22, %23 : vector<8x1xf32>
    %25 = math.rsqrt %24 : vector<8x1xf32>
    %26 = vector.broadcast %25 : vector<8x1xf32> to vector<8x32xf32>
    %27 = arith.mulf %17, %26 : vector<8x32xf32>
    %28 = vector.broadcast %6 : vector<1x32xf32> to vector<8x32xf32>
    %29 = arith.mulf %27, %28 : vector<8x32xf32>
    %30 = vector.broadcast %7 : vector<1x32xf32> to vector<8x32xf32>
    %31 = arith.addf %29, %30 : vector<8x32xf32>
    %c0_9 = arith.constant 0 : index
    %c0_10 = arith.constant 0 : index
    %c0_11 = arith.constant 0 : index
    %32 = vector.load %arg11[%c0_9, %c0_10, %c0_11] : memref<1x32x32xf32, #tpu.memory_space<vmem>>, vector<1x32x32xf32>
    %33 = vector.shape_cast %32 : vector<1x32x32xf32> to vector<32x32xf32>
    %cst_12 = arith.constant dense<0.000000e+00> : vector<8x32xf32>
    %34 = tpu.matmul %31, %33, %cst_12 {dimension_numbers = #tpu.dot_dimension_numbers<[1], [0], [0], [1], [0, 0, 1, 1], [], []>} : vector<8x32xf32>, vector<32x32xf32>, vector<8x32xf32> -> vector<8x32xf32>
    %c0_13 = arith.constant 0 : index
    %c0_14 = arith.constant 0 : index
    %c0_15 = arith.constant 0 : index
    %35 = vector.load %arg12[%c0_13, %c0_14, %c0_15] : memref<1x32x32xf32, #tpu.memory_space<vmem>>, vector<1x32x32xf32>
    %36 = vector.shape_cast %35 : vector<1x32x32xf32> to vector<32x32xf32>
    %cst_16 = arith.constant dense<0.000000e+00> : vector<8x32xf32>
    %37 = tpu.matmul %31, %36, %cst_16 {dimension_numbers = #tpu.dot_dimension_numbers<[1], [0], [0], [1], [0, 0, 1, 1], [], []>} : vector<8x32xf32>, vector<32x32xf32>, vector<8x32xf32> -> vector<8x32xf32>
    %c0_17 = arith.constant 0 : index
    %c0_18 = arith.constant 0 : index
    %c0_19 = arith.constant 0 : index
    %38 = vector.load %arg13[%c0_17, %c0_18, %c0_19] : memref<1x32x32xf32, #tpu.memory_space<vmem>>, vector<1x32x32xf32>
    %39 = vector.shape_cast %38 : vector<1x32x32xf32> to vector<32x32xf32>
    %cst_20 = arith.constant dense<0.000000e+00> : vector<8x32xf32>
    %40 = tpu.matmul %31, %39, %cst_20 {dimension_numbers = #tpu.dot_dimension_numbers<[1], [0], [0], [1], [0, 0, 1, 1], [], []>} : vector<8x32xf32>, vector<32x32xf32>, vector<8x32xf32> -> vector<8x32xf32>
    %c0_21 = arith.constant 0 : index
    %c0_22 = arith.constant 0 : index
    %41 = vector.load %arg3[%c0_21, %c0_22] : memref<8x32xf32, #tpu.memory_space<vmem>>, vector<8x32xf32>
    %c0_23 = arith.constant 0 : index
    %c0_24 = arith.constant 0 : index
    %42 = vector.load %arg4[%c0_23, %c0_24] : memref<8x32xf32, #tpu.memory_space<vmem>>, vector<8x32xf32>
    %c0_25 = arith.constant 0 : index
    %c0_26 = arith.constant 0 : index
    %43 = vector.load %arg5[%c0_25, %c0_26] : memref<8x32xf32, #tpu.memory_space<vmem>>, vector<8x32xf32>
    %c28_i32 = arith.constant 28 : i32
    %44 = tpu.dynamic_rotate %34 by %c28_i32 dim 1 : vector<8x32xf32>, i32 -> vector<8x32xf32>
    %c4_i32 = arith.constant 4 : i32
    %45 = tpu.dynamic_rotate %34 by %c4_i32 dim 1 : vector<8x32xf32>, i32 -> vector<8x32xf32>
    %46 = vector.shape_cast %34 : vector<8x32xf32> to vector<1x8x32xf32>
    %47 = vector.shape_cast %41 : vector<8x32xf32> to vector<1x8x32xf32>
    %48 = arith.mulf %46, %47 : vector<1x8x32xf32>
    %49 = vector.shape_cast %44 : vector<8x32xf32> to vector<1x8x32xf32>
    %50 = vector.shape_cast %42 : vector<8x32xf32> to vector<1x8x32xf32>
    %51 = arith.mulf %49, %50 : vector<1x8x32xf32>
    %52 = arith.addf %48, %51 : vector<1x8x32xf32>
    %53 = vector.shape_cast %45 : vector<8x32xf32> to vector<1x8x32xf32>
    %54 = vector.shape_cast %43 : vector<8x32xf32> to vector<1x8x32xf32>
    %55 = arith.mulf %53, %54 : vector<1x8x32xf32>
    %56 = arith.addf %52, %55 : vector<1x8x32xf32>
    %c28_i32_27 = arith.constant 28 : i32
    %57 = tpu.dynamic_rotate %37 by %c28_i32_27 dim 1 : vector<8x32xf32>, i32 -> vector<8x32xf32>
    %c4_i32_28 = arith.constant 4 : i32
    %58 = tpu.dynamic_rotate %37 by %c4_i32_28 dim 1 : vector<8x32xf32>, i32 -> vector<8x32xf32>
    %59 = vector.shape_cast %37 : vector<8x32xf32> to vector<1x8x32xf32>
    %60 = vector.shape_cast %41 : vector<8x32xf32> to vector<1x8x32xf32>
    %61 = arith.mulf %59, %60 : vector<1x8x32xf32>
    %62 = vector.shape_cast %57 : vector<8x32xf32> to vector<1x8x32xf32>
    %63 = vector.shape_cast %42 : vector<8x32xf32> to vector<1x8x32xf32>
    %64 = arith.mulf %62, %63 : vector<1x8x32xf32>
    %65 = arith.addf %61, %64 : vector<1x8x32xf32>
    %66 = vector.shape_cast %58 : vector<8x32xf32> to vector<1x8x32xf32>
    %67 = vector.shape_cast %43 : vector<8x32xf32> to vector<1x8x32xf32>
    %68 = arith.mulf %66, %67 : vector<1x8x32xf32>
    %69 = arith.addf %65, %68 : vector<1x8x32xf32>
    %c28_i32_29 = arith.constant 28 : i32
    %70 = tpu.dynamic_rotate %40 by %c28_i32_29 dim 1 : vector<8x32xf32>, i32 -> vector<8x32xf32>
    %c4_i32_30 = arith.constant 4 : i32
    %71 = tpu.dynamic_rotate %40 by %c4_i32_30 dim 1 : vector<8x32xf32>, i32 -> vector<8x32xf32>
    %72 = vector.shape_cast %40 : vector<8x32xf32> to vector<1x8x32xf32>
    %73 = vector.shape_cast %41 : vector<8x32xf32> to vector<1x8x32xf32>
    %74 = arith.mulf %72, %73 : vector<1x8x32xf32>
    %75 = vector.shape_cast %70 : vector<8x32xf32> to vector<1x8x32xf32>
    %76 = vector.shape_cast %42 : vector<8x32xf32> to vector<1x8x32xf32>
    %77 = arith.mulf %75, %76 : vector<1x8x32xf32>
    %78 = arith.addf %74, %77 : vector<1x8x32xf32>
    %79 = vector.shape_cast %71 : vector<8x32xf32> to vector<1x8x32xf32>
    %80 = vector.shape_cast %43 : vector<8x32xf32> to vector<1x8x32xf32>
    %81 = arith.mulf %79, %80 : vector<1x8x32xf32>
    %82 = arith.addf %78, %81 : vector<1x8x32xf32>
    %c0_31 = arith.constant 0 : index
    %c0_32 = arith.constant 0 : index
    %83 = vector.load %arg8[%c0_31, %c0_32] : memref<2x32xf32, #tpu.memory_space<vmem>>, vector<2x32xf32>
    %c0_33 = arith.constant 0 : index
    %c0_34 = arith.constant 0 : index
    %84 = vector.load %arg6[%c0_33, %c0_34] : memref<32x2xf32, #tpu.memory_space<vmem>>, vector<32x2xf32>
    %cst_35 = arith.constant dense<0.000000e+00> : vector<8x2xf32>
    %85 = tpu.matmul %34, %84, %cst_35 {dimension_numbers = #tpu.dot_dimension_numbers<[1], [0], [0], [1], [0, 0, 1, 1], [], []>} : vector<8x32xf32>, vector<32x2xf32>, vector<8x2xf32> -> vector<8x2xf32>
    %cst_36 = arith.constant 2.500000e-01 : f32
    %86 = vector.broadcast %cst_36 : f32 to vector<8x2xf32>
    %87 = arith.mulf %85, %86 : vector<8x2xf32>
    %88 = vector.shape_cast %87 : vector<8x2xf32> to vector<1x8x2xf32>
    %cst_37 = arith.constant dense<0xFF800000> : vector<1x2xf32>
    %89 = vector.multi_reduction <maximumf>, %88, %cst_37 [1] : vector<1x8x2xf32> to vector<1x2xf32>
    %90 = vector.shape_cast %89 : vector<1x2xf32> to vector<1x1x2xf32>
    %91 = vector.broadcast %90 : vector<1x1x2xf32> to vector<1x8x2xf32>
    %92 = arith.subf %88, %91 : vector<1x8x2xf32>
    %93 = math.exp %92 : vector<1x8x2xf32>
    %cst_38 = arith.constant dense<0.000000e+00> : vector<1x2xf32>
    %94 = vector.multi_reduction <add>, %93, %cst_38 [1] : vector<1x8x2xf32> to vector<1x2xf32>
    %95 = vector.shape_cast %94 : vector<1x2xf32> to vector<1x1x2xf32>
    %96 = tpu.reciprocal %95 {approx = true} : vector<1x1x2xf32> -> vector<1x1x2xf32>
    %97 = vector.broadcast %96 : vector<1x1x2xf32> to vector<1x8x2xf32>
    %98 = arith.mulf %93, %97 : vector<1x8x2xf32>
    "tpu.trace_start"() <{level = 10 : i32, message = "bnh,bnf->bhf"}> : () -> ()
    %cst_39 = arith.constant dense<0.000000e+00> : vector<1x2x32xf32>
    %99 = tpu.matmul %98, %56, %cst_39 {dimension_numbers = #tpu.dot_dimension_numbers<[1], [1], [2], [2], [0, 0, 0, 2, 1, 2], [0], [0]>} : vector<1x8x2xf32>, vector<1x8x32xf32>, vector<1x2x32xf32> -> vector<1x2x32xf32>
    "tpu.trace_stop"() : () -> ()
    %100 = vector.shape_cast %83 : vector<2x32xf32> to vector<1x2x32xf32>
    %101 = arith.mulf %99, %100 : vector<1x2x32xf32>
    %cst_40 = arith.constant dense<0.000000e+00> : vector<1x32xf32>
    %102 = vector.multi_reduction <add>, %101, %cst_40 [1] : vector<1x2x32xf32> to vector<1x32xf32>
    %103 = vector.shape_cast %102 : vector<1x32xf32> to vector<1x1x32xf32>
    %104 = vector.shape_cast %37 : vector<8x32xf32> to vector<1x8x32xf32>
    %105 = vector.broadcast %103 : vector<1x1x32xf32> to vector<1x8x32xf32>
    %106 = arith.mulf %104, %105 : vector<1x8x32xf32>
    %107 = vector.shape_cast %106 : vector<1x8x32xf32> to vector<8x32xf32>
    %c0_41 = arith.constant 0 : index
    %c0_42 = arith.constant 0 : index
    %108 = vector.load %arg7[%c0_41, %c0_42] : memref<32x2xf32, #tpu.memory_space<vmem>>, vector<32x2xf32>
    %cst_43 = arith.constant dense<0.000000e+00> : vector<8x2xf32>
    %109 = tpu.matmul %107, %108, %cst_43 {dimension_numbers = #tpu.dot_dimension_numbers<[1], [0], [0], [1], [0, 0, 1, 1], [], []>} : vector<8x32xf32>, vector<32x2xf32>, vector<8x2xf32> -> vector<8x2xf32>
    %cst_44 = arith.constant 2.500000e-01 : f32
    %110 = vector.broadcast %cst_44 : f32 to vector<8x2xf32>
    %111 = arith.mulf %109, %110 : vector<8x2xf32>
    %112 = vector.shape_cast %111 : vector<8x2xf32> to vector<1x8x2xf32>
    %cst_45 = arith.constant dense<0xFF800000> : vector<1x2xf32>
    %113 = vector.multi_reduction <maximumf>, %112, %cst_45 [1] : vector<1x8x2xf32> to vector<1x2xf32>
    %114 = vector.shape_cast %113 : vector<1x2xf32> to vector<1x1x2xf32>
    %115 = vector.broadcast %114 : vector<1x1x2xf32> to vector<1x8x2xf32>
    %116 = arith.subf %112, %115 : vector<1x8x2xf32>
    %117 = math.exp %116 : vector<1x8x2xf32>
    %cst_46 = arith.constant dense<0.000000e+00> : vector<1x2xf32>
    %118 = vector.multi_reduction <add>, %117, %cst_46 [1] : vector<1x8x2xf32> to vector<1x2xf32>
    %119 = vector.shape_cast %118 : vector<1x2xf32> to vector<1x1x2xf32>
    %120 = tpu.reciprocal %119 {approx = true} : vector<1x1x2xf32> -> vector<1x1x2xf32>
    %121 = vector.broadcast %120 : vector<1x1x2xf32> to vector<1x8x2xf32>
    %122 = arith.mulf %117, %121 : vector<1x8x2xf32>
    "tpu.trace_start"() <{level = 10 : i32, message = "bnh,bnf->bhf"}> : () -> ()
    %cst_47 = arith.constant dense<0.000000e+00> : vector<1x2x32xf32>
    %123 = tpu.matmul %122, %69, %cst_47 {dimension_numbers = #tpu.dot_dimension_numbers<[1], [1], [2], [2], [0, 0, 0, 2, 1, 2], [0], [0]>} : vector<1x8x2xf32>, vector<1x8x32xf32>, vector<1x2x32xf32> -> vector<1x2x32xf32>
    "tpu.trace_stop"() : () -> ()
    %124 = vector.shape_cast %83 : vector<2x32xf32> to vector<1x2x32xf32>
    %125 = arith.mulf %123, %124 : vector<1x2x32xf32>
    %cst_48 = arith.constant dense<0.000000e+00> : vector<1x32xf32>
    %126 = vector.multi_reduction <add>, %125, %cst_48 [1] : vector<1x2x32xf32> to vector<1x32xf32>
    %127 = vector.shape_cast %126 : vector<1x32xf32> to vector<1x1x32xf32>
    %128 = vector.broadcast %127 : vector<1x1x32xf32> to vector<1x8x32xf32>
    %129 = arith.mulf %82, %128 : vector<1x8x32xf32>
    %130 = vector.shape_cast %129 : vector<1x8x32xf32> to vector<8x32xf32>
    %c0_49 = arith.constant 0 : index
    %c0_50 = arith.constant 0 : index
    %c0_51 = arith.constant 0 : index
    %131 = vector.load %arg14[%c0_49, %c0_50, %c0_51] : memref<1x32x32xf32, #tpu.memory_space<vmem>>, vector<1x32x32xf32>
    %132 = vector.shape_cast %131 : vector<1x32x32xf32> to vector<32x32xf32>
    %cst_52 = arith.constant dense<0.000000e+00> : vector<8x32xf32>
    %133 = tpu.matmul %130, %132, %cst_52 {dimension_numbers = #tpu.dot_dimension_numbers<[1], [0], [0], [1], [0, 0, 1, 1], [], []>} : vector<8x32xf32>, vector<32x32xf32>, vector<8x32xf32> -> vector<8x32xf32>
    %c0_53 = arith.constant 0 : index
    %c0_54 = arith.constant 0 : index
    %c0_55 = arith.constant 0 : index
    %134 = vector.load %arg15[%c0_53, %c0_54, %c0_55] : memref<1x32x32xf32, #tpu.memory_space<vmem>>, vector<1x32x32xf32>
    %135 = vector.shape_cast %134 : vector<1x32x32xf32> to vector<32x32xf32>
    %cst_56 = arith.constant dense<0.000000e+00> : vector<8x32xf32>
    %136 = tpu.matmul %34, %135, %cst_56 {dimension_numbers = #tpu.dot_dimension_numbers<[1], [0], [0], [1], [0, 0, 1, 1], [], []>} : vector<8x32xf32>, vector<32x32xf32>, vector<8x32xf32> -> vector<8x32xf32>
    %137 = arith.addf %133, %136 : vector<8x32xf32>
    %138 = vector.broadcast %10 : vector<1x32xf32> to vector<8x32xf32>
    %139 = arith.addf %137, %138 : vector<8x32xf32>
    %140 = arith.addf %3, %139 : vector<8x32xf32>
    %cst_57 = arith.constant dense<0.000000e+00> : vector<8xf32>
    %141 = vector.multi_reduction <add>, %140, %cst_57 [1] : vector<8x32xf32> to vector<8xf32>
    %142 = vector.shape_cast %141 : vector<8xf32> to vector<8x1xf32>
    %cst_58 = arith.constant 3.200000e+01 : f32
    %143 = vector.broadcast %cst_58 : f32 to vector<8x1xf32>
    %144 = arith.divf %142, %143 : vector<8x1xf32>
    %145 = vector.broadcast %144 : vector<8x1xf32> to vector<8x32xf32>
    %146 = arith.subf %140, %145 : vector<8x32xf32>
    %147 = arith.mulf %146, %146 : vector<8x32xf32>
    %cst_59 = arith.constant dense<0.000000e+00> : vector<8xf32>
    %148 = vector.multi_reduction <add>, %147, %cst_59 [1] : vector<8x32xf32> to vector<8xf32>
    %149 = vector.shape_cast %148 : vector<8xf32> to vector<8x1xf32>
    %cst_60 = arith.constant 3.200000e+01 : f32
    %150 = vector.broadcast %cst_60 : f32 to vector<8x1xf32>
    %151 = arith.divf %149, %150 : vector<8x1xf32>
    %cst_61 = arith.constant 9.99999974E-6 : f32
    %152 = vector.broadcast %cst_61 : f32 to vector<8x1xf32>
    %153 = arith.addf %151, %152 : vector<8x1xf32>
    %154 = math.rsqrt %153 : vector<8x1xf32>
    %155 = vector.broadcast %154 : vector<8x1xf32> to vector<8x32xf32>
    %156 = arith.mulf %146, %155 : vector<8x32xf32>
    %157 = vector.broadcast %8 : vector<1x32xf32> to vector<8x32xf32>
    %158 = arith.mulf %156, %157 : vector<8x32xf32>
    %159 = vector.broadcast %9 : vector<1x32xf32> to vector<8x32xf32>
    %160 = arith.addf %158, %159 : vector<8x32xf32>
    %c0_62 = arith.constant 0 : index
    %c0_63 = arith.constant 0 : index
    %c0_64 = arith.constant 0 : index
    %161 = vector.load %arg16[%c0_62, %c0_63, %c0_64] : memref<1x32x128xf32, #tpu.memory_space<vmem>>, vector<1x32x128xf32>
    %162 = vector.shape_cast %161 : vector<1x32x128xf32> to vector<32x128xf32>
    %cst_65 = arith.constant dense<0.000000e+00> : vector<8x128xf32>
    %163 = tpu.matmul %160, %162, %cst_65 {dimension_numbers = #tpu.dot_dimension_numbers<[1], [0], [0], [1], [0, 0, 1, 1], [], []>} : vector<8x32xf32>, vector<32x128xf32>, vector<8x128xf32> -> vector<8x128xf32>
    %c0_66 = arith.constant 0 : index
    %c0_67 = arith.constant 0 : index
    %c0_68 = arith.constant 0 : index
    %164 = vector.load %arg10[%c0_66, %c0_67, %c0_68] : memref<1x1x128xf32, #tpu.memory_space<vmem>>, vector<1x1x128xf32>
    %165 = vector.shape_cast %164 : vector<1x1x128xf32> to vector<1x128xf32>
    %166 = vector.broadcast %165 : vector<1x128xf32> to vector<8x128xf32>
    %167 = arith.addf %163, %166 : vector<8x128xf32>
    %cst_69 = arith.constant 5.000000e-01 : f32
    %168 = vector.broadcast %cst_69 : f32 to vector<8x128xf32>
    %169 = arith.mulf %168, %167 : vector<8x128xf32>
    %cst_70 = arith.constant 4.471500e-02 : f32
    %170 = vector.broadcast %cst_70 : f32 to vector<8x128xf32>
    %171 = arith.mulf %170, %167 : vector<8x128xf32>
    %172 = arith.mulf %171, %167 : vector<8x128xf32>
    %173 = arith.mulf %172, %167 : vector<8x128xf32>
    %174 = arith.addf %167, %173 : vector<8x128xf32>
    %cst_71 = arith.constant 0.797884583 : f32
    %175 = vector.broadcast %cst_71 : f32 to vector<8x128xf32>
    %176 = arith.mulf %175, %174 : vector<8x128xf32>
    %177 = math.tanh %176 : vector<8x128xf32>
    %cst_72 = arith.constant 1.000000e+00 : f32
    %178 = vector.broadcast %cst_72 : f32 to vector<8x128xf32>
    %179 = arith.addf %178, %177 : vector<8x128xf32>
    %180 = arith.mulf %169, %179 : vector<8x128xf32>
    %c0_73 = arith.constant 0 : index
    %c0_74 = arith.constant 0 : index
    %c0_75 = arith.constant 0 : index
    %181 = vector.load %arg17[%c0_73, %c0_74, %c0_75] : memref<1x128x32xf32, #tpu.memory_space<vmem>>, vector<1x128x32xf32>
    %182 = vector.shape_cast %181 : vector<1x128x32xf32> to vector<128x32xf32>
    %cst_76 = arith.constant dense<0.000000e+00> : vector<8x32xf32>
    %183 = tpu.matmul %180, %182, %cst_76 {dimension_numbers = #tpu.dot_dimension_numbers<[1], [0], [0], [1], [0, 0, 1, 1], [], []>} : vector<8x128xf32>, vector<128x32xf32>, vector<8x32xf32> -> vector<8x32xf32>
    %184 = arith.addf %140, %183 : vector<8x32xf32>
    %185 = vector.broadcast %11 : vector<1x32xf32> to vector<8x32xf32>
    %186 = arith.addf %184, %185 : vector<8x32xf32>
    %c0_77 = arith.constant 0 : index
    %c0_78 = arith.constant 0 : index
    %187 = vector.load %arg19[%c0_77, %c0_78] : memref<8x32xf32, #tpu.memory_space<vmem>>, vector<8x32xf32>
    tpu.vector_store %arg19[%c0_77, %c0_78], %186 {strides = array<i32>} : memref<8x32xf32, #tpu.memory_space<vmem>>, vector<8x32xf32>,
    %c1_i32 = arith.constant 1 : i32
    %188 = arith.cmpi eq, %arg1, %c1_i32 : i32
    %189 = arith.extui %188 : i1 to i32
    %c0_i32_79 = arith.constant 0 : i32
    %190 = arith.cmpi ne, %189, %c0_i32_79 : i32
    scf.if %190 {
      %191 = vector.shape_cast %186 : vector<8x32xf32> to vector<1x8x32xf32>
      %c0_80 = arith.constant 0 : index
      %c0_81 = arith.constant 0 : index
      %c0_82 = arith.constant 0 : index
      %192 = vector.load %arg18[%c0_80, %c0_81, %c0_82] : memref<1x8x32xf32, #tpu.memory_space<vmem>>, vector<1x8x32xf32>
      tpu.vector_store %arg18[%c0_80, %c0_81, %c0_82], %191 {strides = array<i32>} : memref<1x8x32xf32, #tpu.memory_space<vmem>>, vector<1x8x32xf32>,
    } else {
    }
    return
  }
  func.func @transform_0(%arg0: i32, %arg1: i32) -> (i32, i32, i32) {
    %c0_i32 = arith.constant 0 : i32
    %c0_i32_0 = arith.constant 0 : i32
    %c0_i32_1 = arith.constant 0 : i32
    return %arg0, %c0_i32, %c0_i32_0 : i32, i32, i32
  }
  func.func @transform_1(%arg0: i32, %arg1: i32) -> (i32, i32) {
    %c0_i32 = arith.constant 0 : i32
    %c0_i32_0 = arith.constant 0 : i32
    %c0_i32_1 = arith.constant 0 : i32
    return %c0_i32, %c0_i32_0 : i32, i32
  }
  func.func @transform_2(%arg0: i32, %arg1: i32) -> (i32, i32) {
    %c0_i32 = arith.constant 0 : i32
    %c0_i32_0 = arith.constant 0 : i32
    %c0_i32_1 = arith.constant 0 : i32
    return %c0_i32, %c0_i32_0 : i32, i32
  }
  func.func @transform_3(%arg0: i32, %arg1: i32) -> (i32, i32) {
    %c0_i32 = arith.constant 0 : i32
    %c0_i32_0 = arith.constant 0 : i32
    %c0_i32_1 = arith.constant 0 : i32
    return %c0_i32, %c0_i32_0 : i32, i32
  }
  func.func @transform_4(%arg0: i32, %arg1: i32) -> (i32, i32) {
    %c0_i32 = arith.constant 0 : i32
    %c0_i32_0 = arith.constant 0 : i32
    %c0_i32_1 = arith.constant 0 : i32
    return %c0_i32, %c0_i32_0 : i32, i32
  }
  func.func @transform_5(%arg0: i32, %arg1: i32) -> (i32, i32) {
    %c0_i32 = arith.constant 0 : i32
    %c0_i32_0 = arith.constant 0 : i32
    %c0_i32_1 = arith.constant 0 : i32
    return %c0_i32, %c0_i32_0 : i32, i32
  }
  func.func @transform_6(%arg0: i32, %arg1: i32) -> (i32, i32) {
    %c0_i32 = arith.constant 0 : i32
    %c0_i32_0 = arith.constant 0 : i32
    %c0_i32_1 = arith.constant 0 : i32
    return %c0_i32, %c0_i32_0 : i32, i32
  }
  func.func @transform_7(%arg0: i32, %arg1: i32) -> (i32, i32, i32) {
    %c0_i32 = arith.constant 0 : i32
    %c0_i32_0 = arith.constant 0 : i32
    %c0_i32_1 = arith.constant 0 : i32
    return %arg1, %c0_i32, %c0_i32_0 : i32, i32, i32
  }
  func.func @transform_8(%arg0: i32, %arg1: i32) -> (i32, i32, i32) {
    %c0_i32 = arith.constant 0 : i32
    %c0_i32_0 = arith.constant 0 : i32
    %c0_i32_1 = arith.constant 0 : i32
    return %arg1, %c0_i32, %c0_i32_0 : i32, i32, i32
  }
  func.func @transform_9(%arg0: i32, %arg1: i32) -> (i32, i32, i32) {
    %c0_i32 = arith.constant 0 : i32
    %c0_i32_0 = arith.constant 0 : i32
    %c0_i32_1 = arith.constant 0 : i32
    return %arg1, %c0_i32, %c0_i32_0 : i32, i32, i32
  }
  func.func @transform_10(%arg0: i32, %arg1: i32) -> (i32, i32, i32) {
    %c0_i32 = arith.constant 0 : i32
    %c0_i32_0 = arith.constant 0 : i32
    %c0_i32_1 = arith.constant 0 : i32
    return %arg1, %c0_i32, %c0_i32_0 : i32, i32, i32
  }
  func.func @transform_11(%arg0: i32, %arg1: i32) -> (i32, i32, i32) {
    %c0_i32 = arith.constant 0 : i32
    %c0_i32_0 = arith.constant 0 : i32
    %c0_i32_1 = arith.constant 0 : i32
    return %arg1, %c0_i32, %c0_i32_0 : i32, i32, i32
  }
  func.func @transform_12(%arg0: i32, %arg1: i32) -> (i32, i32, i32) {
    %c0_i32 = arith.constant 0 : i32
    %c0_i32_0 = arith.constant 0 : i32
    %c0_i32_1 = arith.constant 0 : i32
    return %arg1, %c0_i32, %c0_i32_0 : i32, i32, i32
  }
  func.func @transform_13(%arg0: i32, %arg1: i32) -> (i32, i32, i32) {
    %c0_i32 = arith.constant 0 : i32
    %c0_i32_0 = arith.constant 0 : i32
    %c0_i32_1 = arith.constant 0 : i32
    return %arg1, %c0_i32, %c0_i32_0 : i32, i32, i32
  }
  func.func @transform_14(%arg0: i32, %arg1: i32) -> (i32, i32, i32) {
    %c0_i32 = arith.constant 0 : i32
    %c0_i32_0 = arith.constant 0 : i32
    %c0_i32_1 = arith.constant 0 : i32
    return %arg1, %c0_i32, %c0_i32_0 : i32, i32, i32
  }
  func.func @transform_15(%arg0: i32, %arg1: i32) -> (i32, i32, i32) {
    %c0_i32 = arith.constant 0 : i32
    %c0_i32_0 = arith.constant 0 : i32
    %c0_i32_1 = arith.constant 0 : i32
    return %arg1, %c0_i32, %c0_i32_0 : i32, i32, i32
  }
  func.func @transform_16(%arg0: i32, %arg1: i32) -> (i32, i32, i32) {
    %c0_i32 = arith.constant 0 : i32
    %c0_i32_0 = arith.constant 0 : i32
    %c0_i32_1 = arith.constant 0 : i32
    return %arg0, %c0_i32, %c0_i32_0 : i32, i32, i32
  }
}

module attributes {stable_mosaic.version = 11 : i64} {
  func.func @logits_head_kernel(%arg0: i32, %arg1: i32, %arg2: memref<1x8x32xf32, #tpu.memory_space<vmem>>, %arg3: memref<1x32xf32, #tpu.memory_space<vmem>>, %arg4: memref<1x32xf32, #tpu.memory_space<vmem>>, %arg5: memref<32x128xf32, #tpu.memory_space<vmem>>, %arg6: memref<1x128xf32, #tpu.memory_space<vmem>>, %arg7: memref<1x8x128xf32, #tpu.memory_space<vmem>>) attributes {dimension_semantics = [#tpu.dimension_semantics<parallel>, #tpu.dimension_semantics<parallel>], iteration_bounds = array<i64: 2, 1>, scalar_prefetch = 0 : i64, scratch_operands = 0 : i64, tpu.core_type = #tpu.core_type<tc>, window_params = [{transform_indices = @transform_0, window_bounds = array<i64: 1, 8, 32>}, {pipeline_mode = #tpu.pipeline_mode<synchronous>, transform_indices = @transform_1, window_bounds = array<i64: 1, 32>}, {pipeline_mode = #tpu.pipeline_mode<synchronous>, transform_indices = @transform_2, window_bounds = array<i64: 1, 32>}, {transform_indices = @transform_3, window_bounds = array<i64: 32, 128>}, {transform_indices = @transform_4, window_bounds = array<i64: 1, 128>}, {transform_indices = @transform_5, window_bounds = array<i64: 1, 8, 128>}]} {
    %c0 = arith.constant 0 : index
    %c0_0 = arith.constant 0 : index
    %c0_1 = arith.constant 0 : index
    %0 = vector.load %arg2[%c0, %c0_0, %c0_1] : memref<1x8x32xf32, #tpu.memory_space<vmem>>, vector<1x8x32xf32>
    %1 = vector.shape_cast %0 : vector<1x8x32xf32> to vector<8x32xf32>
    %c0_2 = arith.constant 0 : index
    %c0_3 = arith.constant 0 : index
    %2 = vector.load %arg3[%c0_2, %c0_3] : memref<1x32xf32, #tpu.memory_space<vmem>>, vector<1x32xf32>
    %c0_4 = arith.constant 0 : index
    %c0_5 = arith.constant 0 : index
    %3 = vector.load %arg4[%c0_4, %c0_5] : memref<1x32xf32, #tpu.memory_space<vmem>>, vector<1x32xf32>
    %cst = arith.constant dense<0.000000e+00> : vector<8xf32>
    %4 = vector.multi_reduction <add>, %1, %cst [1] : vector<8x32xf32> to vector<8xf32>
    %5 = vector.shape_cast %4 : vector<8xf32> to vector<8x1xf32>
    %cst_6 = arith.constant 3.200000e+01 : f32
    %6 = vector.broadcast %cst_6 : f32 to vector<8x1xf32>
    %7 = arith.divf %5, %6 : vector<8x1xf32>
    %8 = vector.broadcast %7 : vector<8x1xf32> to vector<8x32xf32>
    %9 = arith.subf %1, %8 : vector<8x32xf32>
    %10 = arith.mulf %9, %9 : vector<8x32xf32>
    %cst_7 = arith.constant dense<0.000000e+00> : vector<8xf32>
    %11 = vector.multi_reduction <add>, %10, %cst_7 [1] : vector<8x32xf32> to vector<8xf32>
    %12 = vector.shape_cast %11 : vector<8xf32> to vector<8x1xf32>
    %cst_8 = arith.constant 3.200000e+01 : f32
    %13 = vector.broadcast %cst_8 : f32 to vector<8x1xf32>
    %14 = arith.divf %12, %13 : vector<8x1xf32>
    %cst_9 = arith.constant 9.99999974E-6 : f32
    %15 = vector.broadcast %cst_9 : f32 to vector<8x1xf32>
    %16 = arith.addf %14, %15 : vector<8x1xf32>
    %17 = math.rsqrt %16 : vector<8x1xf32>
    %18 = vector.broadcast %17 : vector<8x1xf32> to vector<8x32xf32>
    %19 = arith.mulf %9, %18 : vector<8x32xf32>
    %20 = vector.broadcast %2 : vector<1x32xf32> to vector<8x32xf32>
    %21 = arith.mulf %19, %20 : vector<8x32xf32>
    %22 = vector.broadcast %3 : vector<1x32xf32> to vector<8x32xf32>
    %23 = arith.addf %21, %22 : vector<8x32xf32>
    %c0_10 = arith.constant 0 : index
    %c0_11 = arith.constant 0 : index
    %24 = vector.load %arg5[%c0_10, %c0_11] : memref<32x128xf32, #tpu.memory_space<vmem>>, vector<32x128xf32>
    %cst_12 = arith.constant dense<0.000000e+00> : vector<8x128xf32>
    %25 = tpu.matmul %23, %24, %cst_12 {dimension_numbers = #tpu.dot_dimension_numbers<[1], [0], [0], [1], [0, 0, 1, 1], [], []>} : vector<8x32xf32>, vector<32x128xf32>, vector<8x128xf32> -> vector<8x128xf32>
    %c0_13 = arith.constant 0 : index
    %c0_14 = arith.constant 0 : index
    %26 = vector.load %arg6[%c0_13, %c0_14] : memref<1x128xf32, #tpu.memory_space<vmem>>, vector<1x128xf32>
    %27 = vector.broadcast %26 : vector<1x128xf32> to vector<8x128xf32>
    %28 = arith.addf %25, %27 : vector<8x128xf32>
    %29 = vector.shape_cast %28 : vector<8x128xf32> to vector<1x8x128xf32>
    %c0_15 = arith.constant 0 : index
    %c0_16 = arith.constant 0 : index
    %c0_17 = arith.constant 0 : index
    %30 = vector.load %arg7[%c0_15, %c0_16, %c0_17] : memref<1x8x128xf32, #tpu.memory_space<vmem>>, vector<1x8x128xf32>
    tpu.vector_store %arg7[%c0_15, %c0_16, %c0_17], %29 {strides = array<i32>} : memref<1x8x128xf32, #tpu.memory_space<vmem>>, vector<1x8x128xf32>,
    return
  }
  func.func @transform_0(%arg0: i32, %arg1: i32) -> (i32, i32, i32) {
    %c0_i32 = arith.constant 0 : i32
    %c0_i32_0 = arith.constant 0 : i32
    %c0_i32_1 = arith.constant 0 : i32
    return %arg0, %c0_i32, %c0_i32_0 : i32, i32, i32
  }
  func.func @transform_1(%arg0: i32, %arg1: i32) -> (i32, i32) {
    %c0_i32 = arith.constant 0 : i32
    %c0_i32_0 = arith.constant 0 : i32
    %c0_i32_1 = arith.constant 0 : i32
    return %c0_i32, %c0_i32_0 : i32, i32
  }
  func.func @transform_2(%arg0: i32, %arg1: i32) -> (i32, i32) {
    %c0_i32 = arith.constant 0 : i32
    %c0_i32_0 = arith.constant 0 : i32
    %c0_i32_1 = arith.constant 0 : i32
    return %c0_i32, %c0_i32_0 : i32, i32
  }
  func.func @transform_3(%arg0: i32, %arg1: i32) -> (i32, i32) {
    %c0_i32 = arith.constant 0 : i32
    %c0_i32_0 = arith.constant 0 : i32
    return %c0_i32, %arg1 : i32, i32
  }
  func.func @transform_4(%arg0: i32, %arg1: i32) -> (i32, i32) {
    %c0_i32 = arith.constant 0 : i32
    %c0_i32_0 = arith.constant 0 : i32
    return %c0_i32, %arg1 : i32, i32
  }
  func.func @transform_5(%arg0: i32, %arg1: i32) -> (i32, i32, i32) {
    %c0_i32 = arith.constant 0 : i32
    %c0_i32_0 = arith.constant 0 : i32
    return %arg0, %c0_i32, %arg1 : i32, i32, i32
  }
}

</mosaic_0001>

<bundles_post_ra>
// kernel: _fused_forward.3
= control target key start
LH: loop header
LB: loop body
LE: loop exit
PB: predicated region body
PF: predicated region fallthrough
CT: control target
= control target key end

     0   :  { %10 = vsyncpa [#allocation3], 0  ;;  %s759_s0 = inlined_call_operand.vmem [shape: f32[2,8,32], index: 0, kind: input, shape index: {}]   ;;  %s760_s1 = inlined_call_operand.vmem [shape: f32[1,32], index: 1, kind: input, shape index: {}]   ;;  %s761_s2 = inlined_call_operand.vmem [shape: f32[1,32], index: 2, kind: input, shape index: {}]   ;;  %s762_s3 = inlined_call_operand.vmem [shape: f32[32,128], index: 3, kind: input, shape index: {}]   ;;  %s763_s4 = inlined_call_operand.vmem [shape: f32[1,128], index: 4, kind: input, shape index: {}]   ;;  %s764_s5 = inlined_call_operand.hbm [shape: f32[2,8,128], index: 5, kind: output, shape index: {}]  }
   0x1   :  { %12 = vsyncpa [#allocation3 + $0x1], 0  ;;  %s638_s18 = smov 0   ;;  %s640_s19 = smov 0  }
   0x2   :  { %s642_s20 = smov 0   ;;  %s644_s21 = smov 0  }
   0x3   :  { %s646_s22 = smov 0   ;;  %s648_s23 = smov 0  }
   0x4 LB: > { %s450_s24 = sadd.s32 4294967295, %s605_s23   ;;  %s451_s25 = sadd.s32 4294967294, %s605_s23   ;;  %s605_s23 = sphi %s648_s23, %s18_s23   ;;  %s601_s22 = sphi %s646_s22, %s771_s22   ;;  %s597_s21 = sphi %s644_s21, %s770_s21   ;;  %s593_s20 = sphi %s642_s20, %s769_s20   ;;  %s589_s19 = sphi %s640_s19, %s768_s19   ;;  %s585_s18 = sphi %s638_s18, %s767_s18  }
   0x5   : > { %s30_s26 = sadd.s32 1, %s601_s22  ;;  %s159_s27 = sadd.s32 1, %s593_s20 }
   0x6   : > { %p32_p0 = scmp.ge.s32.totalorder %s30_s26, 2  ;;  %p169_p1 = scmp.ne.s32.totalorder %s593_s20, %s589_s19 }
   0x7   : > { %p170_p2 = scmp.eq.s32.totalorder %s450_s24, 1  ;;  %p175_p3 = scmp.ne.s32.totalorder %s589_s19, %s585_s18 }
   0x8   : > { %s773_s26 = smov (%p32_p0, %s30_s26), 0  ;;  %p176_p5 = scmp.eq.s32.totalorder %s451_s25, 1 }
   0x9   : > { %p678_p4 = por %p170_p2, %p169_p1  ;;  %s154_s29 = ssub.s32 %s601_s22, %s773_s26 }
   0xa   : > { %p456_p6 = scmp.ge.s32.totalorder %s605_s23, 1  ;;  %p157_p7 = scmp.eq.s32.totalorder %s154_s29, 0 }
   0xb   : > { %p685_p8 = por %p176_p5, %p175_p3  ;;  %p220_p9 = scmp.lt.s32.totalorder %s605_s23, 3 }
   0xc   : > { %s691_s6 = scalar_select %p157_p7, %s593_s20, %s159_s27  }
   0xd   : > { %p221_p10 = pnand %p456_p6, %p220_p9 }
   0xe   : > { %p254_p11 = scmp.lt.s32.totalorder (!%p221_p10), %s597_s21, 1  ;;  %s251_s9 = sand.u32 (!%p221_p10), 1, %s589_s19  }
   0xf   : > { %224 = sbr.rel (%p221_p10) target bundleno = 424 (0x1a8), region = 40  ;;  %s457_s10 = sshll.u32 (!%p221_p10), %s251_s9, 3 }
  0x10   : > { %s253_s17 = scalar_lea.vmem (!%p221_p10), [#allocation2], %s457_s10  ;;  %s339_s27 = scalar_lea.sflag (!%p221_p10), [#allocation3], %s251_s9 }
  0x11   : > { %s352_s24 = sshll.u32 (!%p221_p10), %s253_s17, 4  ;;  %s353_s24 = int_to_ptr.vmem [resolvable:$true] %s352_s24 }
  0x14   : > { %s255_s7 = scalar_select %p254_p11, %s597_s21, 1  ;;  %vm268_vm0 = vcmask 261120   ;;  %v607_v2 = vmov 32.0   ;;  %v309_v14 = vld [vmem:[%s762_s3 + $0x18] sm:$0xff]  ;;  %v308_v15 = vld [vmem:[%s762_s3 + $0x10] sm:$0xff]  ;;  %v307_v16 = vld [vmem:[%s762_s3 + $0x8] sm:$0xff] }
  0x15   : > { %523 = vrcp.f32 %v607_v2  ;;  %329 = vmatpush.msra.mxu0 %v309_v14  ;;  %v306_v17 = vld [vmem:[%s762_s3] sm:$0xff] }
  0x16   : > { %s458_s8 = sshll.u32 %s255_s7, 3  ;;  %v520_v27 = vld [vmem:[%s760_s1] ss:$0 sm:$0xff] }
  0x17   : > { %s257_s11 = scalar_lea.vmem %s759_s0, %s458_s8  ;;  %330 = vmatpush.msra.mxu0 %v308_v15  ;;  %v521_v30 = vld [vmem:[%s761_s2] ss:$0 sm:$0xff] }
  0x18   : > { %v265_v0 = vld [vmem:[%s257_s11] sm:$0xff]  ;;  %s461_s11 = sshll.u32 %s597_s21, 3 }
  0x19   : > { %v269_v1 = vsel %vm268_vm0, %v265_v0, 0.0  ;;  %331 = vmatpush.msra.mxu0 %v307_v16  ;;  %s350_s14 = scalar_lea.hbm %s764_s5, %s461_s11  ;;  %v522_v33 = vld [vmem:[%s763_s4] ss:$0 sm:$0xff]  ;;  %s547_s11 = scalar_lea.hbm %s764_s5, 16 }
  0x1a   : > { %270 = vadd.xlane.f32.xlu0 %v269_v1  ;;  %s354_s25 = sshll.u32 %s350_s14, 4  ;;  %s355_s25 = int_to_ptr.hbm [resolvable:$true] %s354_s25 }
  0x1b   : > { %v524_v3 = vpop.eup %523  ;;  %332 = vmatpush.msra.mxu0 %v306_v17  ;;  %s541_s29 = sshra.s32 %s355_s25, 4  ;;  %s542_s29 = int_to_ptr.hbm [resolvable:$true] %s541_s29 }
  0x1c   : > { %v273_v4 = vmul.f32 32.0, %v524_v3  ;;  %vm277_vm1 = vweird.f32 %v524_v3  ;;  %s543_s21 = scalar_lea.hbm %s542_s29, 8  ;;  %p548_p1 = scmp.lt.s32.totalorder %s542_s29, %s764_s5 }
  0x1d   : > { %p544_p12 = scmp.ne.s32.totalorder %s542_s29, %s543_s21  ;;  %p549_p2 = scmp.lt.s32.totalorder %s547_s11, %s543_s21 }
  0x1e   : > { %v274_v5 = vsub.f32 1.0, %v273_v4 }
  0x1f   : > { %p545_p13 = pnand %p544_p12, %p678_p4  ;;  %p550_p3 = por %p549_p2, %p548_p1 }
  0x20   : > { %v275_v6 = vmul.f32 %v524_v3, %v274_v5 }
  0x21   : > { %p546_p0 = pneg %p545_p13 }
  0x22   : > { %v276_v7 = vadd.f32 %v524_v3, %v275_v6 }
  0x23   : > { %p551_p5 = pnand %p550_p3, %p546_p0 }
  0x24   : > { %v278_v8 = vsel %vm277_vm1, %v524_v3, %v276_v7 }
  0x8d   : > { %v271_v9 = vpop.xlane.xlu0 %270 }
  0x8e   : > { %v279_v10 = vmul.f32 %v278_v8, %v271_v9 }
  0x90   : > { %v280_v11 = vsub.f32 %v265_v0, %v279_v10 }
  0x92   : > { %v281_v12 = vmul.f32 %v280_v11, %v280_v11 }
  0x94   : > { %v282_v13 = vsel %vm268_vm0, %v281_v12, 0.0 }
  0x95   : > { %283 = vadd.xlane.f32.xlu0 %v282_v13 }
 0x108   : > { %v284_v18 = vpop.xlane.xlu0 %283 }
 0x109   : > { %v285_v19 = vmul.f32 %v284_v18, %v278_v8 }
 0x10b   : > { %v286_v20 = vadd.f32 1e-05, %v285_v19 }
 0x10d   : > { %525 = vrsqrt.f32 %v286_v20  ;;  %vm293_vm3 = vweird.f32 %v286_v20 }
 0x113   : > { %v526_v21 = vpop.eup %525 }
 0x114   : > { %v288_v22 = vmul.f32 %v526_v21, %v286_v20  ;;  %vm294_vm2 = vweird.f32 %v526_v21 }
 0x115   : > { %vm295_vm4 = vmor %vm293_vm3, %vm294_vm2 }
 0x116   : > { %v289_v23 = vmul.f32 %v526_v21, %v288_v22 }
 0x118   : > { %v290_v24 = vmul.f32 0.5, %v289_v23 }
 0x11a   : > { %v291_v25 = vsub.f32 1.5, %v290_v24 }
 0x11c   : > { %v292_v26 = vmul.f32 %v526_v21, %v291_v25 }
 0x11e   : > { %v296_v28 = vsel %vm295_vm4, %v526_v21, %v292_v26 }
 0x11f   : > { %v297_v29 = vmul.f32 %v296_v28, %v280_v11 }
 0x121   : > { %v301_v31 = vmul.f32 %v520_v27, %v297_v29 }
 0x123   : > { %v305_v32 = vadd.f32 %v521_v30, %v301_v31 }
 0x125   : > { %459 = vmatmul.msk.f32.vlgmr.msra.gmra.mxu0 %vm268_vm0, %v305_v32 }
 0x1a2   : > { %v334_v34 = vpop.f32.mrf.mxu0 }
 0x1a3   : > { %v335_v35 = vadd.f32 %v522_v33, %v334_v34 }
 0x1a5   : > { %337 = vst [vmem:[%s253_s17] sm:$0xff] %v335_v35 }
 0x1a6   : > { %554 = shalt.err (!%p551_p5)
}
 0x1a7   : > { %464 = dma.vmem_to_hbm [thread:$0]  (%p678_p4), %s353_s24, 128, %s355_s25, %s339_s27  }
 0x1a8 PF: > { %p470_p6 = scmp.ge.s32.totalorder %s605_s23, 2  ;;  %s366_s9 = sand.u32 1, %s585_s18  }
 0x1a9   : > { %s367_s13 = scalar_lea.sflag [#allocation3], %s366_s9 }
 0x1aa   : > { %p467_p7 = pnand %p470_p6, %p685_p8 }
 0x1ac   : > { %p468_p9 = pneg %p467_p7 }
 0x1ae   : > { %580 = dma.done.wait (%p468_p9), %s367_s13, 128  }
 0x1af   : > { %582 = vsyncadd (%p468_p9), %s367_s13, 4294967168  ;;  %s18_s23 = sadd.s32 1, %s605_s23   ;;  %s767_s18 = smov %s589_s19 }
 0x1b0   : > { %p15_p10 = scmp.ge.s32.totalorder %s18_s23, 4   ;;  %s768_s19 = smov %s593_s20 }
 0x1b1   : > { %s769_s20 = smov %s691_s6  ;;  %s770_s21 = smov %s601_s22 }
 0x1b2   : > { %s771_s22 = smov %s773_s26  ;;  %17 = sbr.rel (!%p15_p10) target bundleno = 4 (0x4), region = 81 }
 0x1b7   :  { %373 = vsyncpa [#allocation3], 1 }
 0x1b8   :  { %375 = vsyncpa [#allocation3 + $0x1], 1 }

// kernel: _fused_forward.2
= control target key start
LH: loop header
LB: loop body
LE: loop exit
PB: predicated region body
PF: predicated region fallthrough
CT: control target
= control target key end

     0   :  { %s2338_s0 = inlined_call_operand.hbm [shape: f32[2,8,32], index: 0, kind: input, shape index: {}]   ;;  %s2339_s1 = inlined_call_operand.vmem [shape: f32[8,32], index: 1, kind: input, shape index: {}]   ;;  %s2340_s2 = inlined_call_operand.vmem [shape: f32[8,32], index: 2, kind: input, shape index: {}]   ;;  %s2341_s3 = inlined_call_operand.vmem [shape: f32[8,32], index: 3, kind: input, shape index: {}]   ;;  %s2342_s4 = inlined_call_operand.vmem [shape: f32[32,2], index: 4, kind: input, shape index: {}]   ;;  %s2343_s5 = inlined_call_operand.vmem [shape: f32[32,2], index: 5, kind: input, shape index: {}]   ;;  %s2344_s6 = inlined_call_operand.vmem [shape: f32[2,32], index: 6, kind: input, shape index: {}]   ;;  %s2345_s7 = inlined_call_operand.vmem [shape: f32[2,6,32], index: 7, kind: input, shape index: {}]   ;;  %s2346_s8 = inlined_call_operand.vmem [shape: f32[2,1,128], index: 8, kind: input, shape index: {}]   ;;  %s2347_s9 = inlined_call_operand.vmem [shape: f32[2,32,32], index: 9, kind: input, shape index: {}]   ;;  %s2348_s10 = inlined_call_operand.vmem [shape: f32[2,32,32], index: 10, kind: input, shape index: {}]   ;;  %s2349_s11 = inlined_call_operand.vmem [shape: f32[2,32,32], index: 11, kind: input, shape index: {}]   ;;  %s2350_s12 = inlined_call_operand.vmem [shape: f32[2,32,32], index: 12, kind: input, shape index: {}]   ;;  %s2351_s13 = inlined_call_operand.vmem [shape: f32[2,32,32], index: 13, kind: input, shape index: {}]   ;;  %s2352_s14 = inlined_call_operand.hbm [shape: f32[2,32,128], index: 14, kind: input, shape index: {}]   ;;  %s2353_s15 = inlined_call_operand.vmem [shape: f32[2,128,32], index: 15, kind: input, shape index: {}]   ;;  %s2354_s16 = inlined_call_operand.vmem [shape: f32[2,8,32], index: 16, kind: output, shape index: {}]  }
   0x1   :  { %2364 = sst [smem:[#allocation18_spill]] %s2338_s0 }
   0x2   :  { %2365 = sst [smem:[#allocation19_spill]] %s2339_s1 }
   0x3   :  { %2366 = sst [smem:[#allocation20_spill]] %s2340_s2 }
   0x4   :  { %2367 = sst [smem:[#allocation21_spill]] %s2341_s3 }
   0x5   :  { %2368 = sst [smem:[#allocation22_spill]] %s2342_s4 }
   0x6   :  { %2369 = sst [smem:[#allocation23_spill]] %s2343_s5 }
   0x7   :  { %2370 = sst [smem:[#allocation24_spill]] %s2344_s6 }
   0x8   :  { %2371 = sst [smem:[#allocation25_spill]] %s2345_s7 }
   0x9   :  { %2372 = sst [smem:[#allocation26_spill]] %s2347_s9 }
   0xa   :  { %2373 = sst [smem:[#allocation27_spill]] %s2348_s10 }
   0xb   :  { %2374 = sst [smem:[#allocation28_spill]] %s2349_s11 }
   0xc   :  { %2375 = sst [smem:[#allocation29_spill]] %s2350_s12 }
   0xd   :  { %2376 = sst [smem:[#allocation30_spill]] %s2351_s13 }
   0xe   :  { %2377 = sst [smem:[#allocation31_spill]] %s2352_s14 }
   0xf   :  { %2378 = sst [smem:[#allocation32_spill]] %s2353_s15 }
  0x10   :  { %2379 = sst [smem:[#allocation33_spill]] %s2354_s16 }
  0x11   :  { %21 = vsyncpa [#allocation4], 0 }
  0x12   :  { %23 = vsyncpa [#allocation4 + $0x1], 0 }
  0x13   :  { %24 = vsyncpa [#allocation6], 0 }
  0x14   :  { %26 = vsyncpa [#allocation6 + $0x1], 0  ;;  %s1936_s21 = smov 0   ;;  %s1938_s22 = smov 0  }
  0x15   :  { %s1940_s23 = smov 0   ;;  %s1942_s24 = smov 0  }
  0x16   :  { %s1944_s25 = smov 0   ;;  %s1946_s26 = smov 0  }
  0x17   :  { %s1948_s27 = smov 0   ;;  %s1950_s28 = smov 0  }
  0x18   :  { %s1952_s29 = smov 0   ;;  %s1954_s30 = smov 0  }
  0x19   :  { %s1956_s0 = smov 0  }
  0x1a LB: > { %2380 = sst [smem:[#allocation9_spill]] %s1817_s25  ;;  %s1514_s17 = sadd.s32 4294967295, %s1841_s0   ;;  %s1841_s0 = sphi %s1956_s0, %s32_s0   ;;  %s1837_s30 = sphi %s1954_s30, %s2424_s30   ;;  %s1833_s29 = sphi %s1952_s29, %s2423_s29   ;;  %s1829_s28 = sphi %s1950_s28, %s2422_s28   ;;  %s1825_s27 = sphi %s1948_s27, %s2421_s27   ;;  %s1821_s26 = sphi %s1946_s26, %s2420_s26   ;;  %s1817_s25 = sphi %s1944_s25, %s2419_s25   ;;  %s1813_s24 = sphi %s1942_s24, %s2418_s24   ;;  %s1809_s23 = sphi %s1940_s23, %s2427_s23   ;;  %s1805_s22 = sphi %s1938_s22, %s2426_s22   ;;  %s1801_s21 = sphi %s1936_s21, %s2425_s21  }
  0x1b   : > { %2381 = sst [smem:[#allocation10_spill]] %s1821_s26  ;;  %p58_p0 = scmp.ne.s32.totalorder %s1821_s26, %s1817_s25 }
  0x1c   : > { %2382 = sst [smem:[#allocation11_spill]] %s1833_s29  ;;  %p59_p1 = scmp.eq.s32.totalorder %s1841_s0, 0 }
  0x1d   : > { %2383 = sst [smem:[#allocation12_spill]] %s1837_s30  ;;  %p64_p2 = scmp.ne.s32.totalorder %s1817_s25, %s1813_s24 }
  0x1e   : > { %2384 = sst [smem:[#allocation13_spill]] %s1841_s0  ;;  %p65_p3 = scmp.eq.s32.totalorder %s1514_s17, 0 }
  0x1f   : > { %p392_p4 = scmp.ne.s32.totalorder %s1809_s23, %s1805_s22  ;;  %p1996_p5 = por %p59_p1, %p58_p0 }
  0x20   : > { %p398_p6 = scmp.ne.s32.totalorder %s1805_s22, %s1801_s21  ;;  %p2001_p7 = por %p65_p3, %p64_p2 }
  0x21   : > { %p2005_p8 = por %p392_p4, %p59_p1  ;;  %p1572_p10 = scmp.lt.s32.totalorder %s1841_s0, 4 }
  0x22   : > { %p2009_p9 = por %p398_p6, %p65_p3  ;;  %s492_s17 = sand.u32 1, %s1821_s26  }
  0x23   : > { %s1518_s19 = sshll.u32 %s492_s17, 3  ;;  %s1519_s21 = sshll.u32 %s1837_s30, 3 }
  0x24   : > { %s2389_s3 = sld [smem:[#allocation18_spill]]  ;;  %s496_s4 = scalar_lea.vmem [#allocation3], %s1518_s19 }
  0x25   : > { %s504_s16 = sshll.u32 %s496_s4, 4  ;;  %p1566_p11 = pnand %p1572_p10, %p1996_p5  ;;  %s505_s16 = int_to_ptr.vmem [resolvable:$true] %s504_s16 }
  0x26   : > { %p2023_p12 = pnand %p1572_p10, %p2005_p8  ;;  %p1523_p13 = scmp.ge.s32.totalorder %s1841_s0, 1 }
  0x27   : > { %p592_p0 = scmp.lt.s32.totalorder %s1841_s0, 5  ;;  %s493_s1 = scalar_lea.sflag [#allocation4], %s492_s17 }
  0x28   : > { %s564_s4 = sand.u32 1, %s1809_s23   ;;  %s41_s5 = sadd.s32 1, %s1833_s29 }
  0x29   : > { %p2029_p1 = pnand %p1523_p13, %p592_p0  ;;  %p42_p2 = scmp.ge.s32.totalorder %s41_s5, 2 }
  0x2a   : > { %s500_s2 = scalar_lea.hbm %s2389_s3, %s1519_s21  ;;  %s1520_s19 = sshll.u32 %s564_s4, 5 }
  0x2b   : > { %s502_s15 = sshll.u32 %s500_s2, 4  ;;  %s385_s2 = sadd.s32 1, %s1809_s23  ;;  %s503_s15 = int_to_ptr.hbm [resolvable:$true] %s502_s15 }
  0x2c   : > { %1568 = dma.hbm_to_vmem [thread:$0]  (!%p1566_p11), %s503_s15, 128, %s505_s16, %s493_s1  }
  0x2d   : > { %s1554_s18 = sshll.u32 %s1833_s29, 5  ;;  %s2429_s5 = smov (%p42_p2, %s41_s5), 0 }
  0x2e   : > { %2392 = sst [smem:[#allocation14_spill]] %s2429_s5  ;;  %s2393_s20 = sadd.s32 1, %s1837_s30 }
  0x2f   : > { %s2431_s20 = smov (!%p42_p2, %s2393_s20), %s1837_s30  ;;  %s382_s15 = ssub.s32 %s1833_s29, %s2429_s5 }
  0x30   : > { %s2394_s14 = sld [smem:[#allocation31_spill]]  ;;  %p46_p3 = scmp.ge.s32.totalorder %s2431_s20, 2 }
  0x31   : > { %p383_p4 = scmp.eq.s32.totalorder %s382_s15, 0  ;;  %s568_s0 = scalar_lea.vmem [#allocation5], %s1520_s19 }
  0x32   : > { %s576_s12 = sshll.u32 %s568_s0, 4  ;;  %s2433_s20 = smov (%p46_p3, %s2431_s20), 0  ;;  %s577_s12 = int_to_ptr.vmem [resolvable:$true] %s576_s12 }
  0x33   : > { %2395 = sst [smem:[#allocation15_spill]] %s2433_s20  ;;  %s48_s10 = ssub.s32 %s1837_s30, %s2433_s20 }
  0x34   : > { %s2050_s11 = scalar_select %p383_p4, %s1809_s23, %s385_s2  }
  0x35   : > { %p49_p5 = scmp.eq.s32.totalorder %s48_s10, 0  ;;  %s2397_s5 = sadd.s32 1, %s1821_s26 }
  0x36   : > { %s573_s21 = scalar_lea.hbm %s2394_s14, %s1554_s18  ;;  %2396 = sst [smem:[#allocation16_spill]] %s2050_s11 }
  0x37   : > { %s574_s1 = sshll.u32 %s573_s21, 4  ;;  %s565_s16 = scalar_lea.sflag [#allocation6], %s564_s4  ;;  %s575_s1 = int_to_ptr.hbm [resolvable:$true] %s574_s1 }
  0x38   : > { %s2057_s29 = scalar_select %p49_p5, %s1821_s26, %s2397_s5  }
  0x39   : > { %s1843_s18 = smov 128   ;;  %s1844_s17 = smov 8  }
  0x3a   : > { %2398 = sst [smem:[#allocation17_spill]] %s2057_s29  ;;  %596 = sbr.rel (%p2029_p1) target bundleno = 2156 (0x86c), region = 84 }
  0x3b   : > { %1571 = dma.hbm_to_vmem [thread:$0]  (!%p2023_p12), %s575_s1, 512, %s577_s12, %s565_s16, %s1843_s18, %s1843_s18, %s1844_s17  }
  0x3c   : > { %s598_s0 = sand.u32 (!%p2029_p1), 1, %s1817_s25  }
  0x3d   : > { %s2064_s2 = sshll.u32 (!%p2029_p1), %s598_s0, 3  ;;  %s599_s19 = scalar_lea.sflag (!%p2029_p1), [#allocation4], %s598_s0 }
  0x3e   : > { %s602_s10 = scalar_lea.vmem (!%p2029_p1), [#allocation3], %s2064_s2 }
  0x3f   : > { %1792 = dma.done.wait (%p2001_p7), %s599_s19, 128  }
  0x40   : > { %1794 = vsyncadd (%p2001_p7), %s599_s19, 4294967168  ;;  %s608_s13 = sand.u32 1, %s1805_s22  }
  0x41   : > { %s1525_s12 = sshll.u32 %s608_s13, 5  ;;  %s609_s4 = scalar_lea.sflag [#allocation6], %s608_s13 }
  0x42   : > { %s2072_s3 = scalar_lea.vmem [#allocation5], %s1525_s12 }
  0x43   : > { %1796 = dma.done.wait (%p2009_p9), %s609_s4, 512  }
  0x44   : > { %1798 = vsyncadd (%p2009_p9), %s609_s4, 4294966784  ;;  %p703_p6 = scmp.lt.s32.totalorder %s1825_s27, 1  ;;  %p740_p8 = scmp.lt.s32.totalorder %s1829_s28, 1 }
  0x45   : > { %s2399_s7 = sld [smem:[#allocation25_spill]]  ;;  %p1540_p7 = scmp.ne.s32.totalorder %s1825_s27, 0 }
  0x46   : > { %s2081_s6 = scalar_select %p703_p6, %s1825_s27, 1 }
  0x47   : > { %s2435_s28 = smov (!%p740_p8, %s1829_s28), 1  ;;  %s2400_s9 = sld [smem:[#allocation26_spill]] }
  0x48   : > { %s1526_s5 = sshll.u32 %s2081_s6, 3  ;;  %s1555_s17 = sshll.u32 %s2081_s6, 5 }
  0x49   : > { %s2401_s4 = sld [smem:[#allocation27_spill]]  ;;  %s1539_s25 = sshll.u32 %s2435_s28, 3 }
  0x4a   : > { %s2402_s15 = sld [smem:[#allocation28_spill]] }
  0x4b   : > { %s2092_s18 = scalar_lea.vmem %s2399_s7, %s1526_s5  ;;  %s2403_s5 = sld [smem:[#allocation29_spill]] }
  0x4c   : > { %s2404_s0 = sld [smem:[#allocation30_spill]] }
  0x4d   : > { %s2098_s19 = scalar_lea.vmem %s2400_s9, %s1555_s17  ;;  %s1560_s9 = sshll.u32 %s2081_s6, 7 }
  0x4e   : > { %s2405_s12 = sld [smem:[#allocation32_spill]] }
  0x4f   : > { %s2103_s14 = scalar_lea.vmem %s2401_s4, %s1555_s17 }
  0x50   : > { %s2108_s21 = scalar_lea.vmem %s2402_s15, %s1555_s17  ;;  %s2406_s15 = sld [smem:[#allocation33_spill]] }
  0x51   : > { %s2113_s16 = scalar_lea.vmem %s2403_s5, %s1555_s17 }
  0x52   : > { %s2118_s2 = scalar_lea.vmem %s2404_s0, %s1555_s17  ;;  %747 = sbr.rel (%p1540_p7) target bundleno = 89 (0x59), region = 96 }
  0x54   : > { %s2124_s4 = scalar_lea.vmem %s2405_s12, %s1560_s9 }
  0x56   : > { %s2129_s11 = scalar_lea.vmem %s2406_s15, %s1539_s25 }
  0x57   : > { %v748_v0 = vld [vmem:[%s602_s10] sm:$0xff]  ;;  %vm749_vm0 = vcmask 261120  }
  0x58   : > { %750 = vst.msk [vmem:[#allocation2] sm:$0xff] %vm749_vm0, %v748_v0 }
  0x59 PF: > { %vm753_vm1 = vcmask 261120   ;;  %v1845_v3 = vmov 32.0   ;;  %v790_v15 = vld [vmem:[%s2098_s19 + $0x18] sm:$0xff]  ;;  %v789_v18 = vld [vmem:[%s2098_s19 + $0x10] sm:$0xff]  ;;  %v788_v21 = vld [vmem:[%s2098_s19 + $0x8] sm:$0xff]  ;;  %s2407_s25 = sld [smem:[#allocation22_spill]] }
  0x5a   : > { %1671 = vrcp.f32 %v1845_v3  ;;  %v817_v16 = vld [vmem:[%s2103_s14 + $0x18] sm:$0xff]  ;;  %806 = vmatpush.msra.mxu0 %v790_v15  ;;  %v816_v19 = vld [vmem:[%s2103_s14 + $0x10] sm:$0xff]  ;;  %v815_v22 = vld [vmem:[%s2103_s14 + $0x8] sm:$0xff]  ;;  %s1846_s17 = smov 32   ;;  %s2409_s24 = sld [smem:[#allocation20_spill]]  ;;  %vm865_vm6 = vcmask 1047808  }
  0x5b   : > { %v841_v17 = vld [vmem:[%s2108_s21 + $0x18] sm:$0xff]  ;;  %830 = vmatpush.msra.mxu1 %v817_v16  ;;  %v840_v20 = vld [vmem:[%s2108_s21 + $0x10] sm:$0xff]  ;;  %v839_v23 = vld [vmem:[%s2108_s21 + $0x8] sm:$0xff]  ;;  %s1847_s5 = smov 4   ;;  %s2410_s12 = sld [smem:[#allocation21_spill]]  ;;  %vm960_vm7 = vcmask 15360  }
  0x5c   : > { %854 = vmatpush.msra.mxu3 %v841_v17  ;;  %807 = vmatpush.msra.mxu0 %v789_v18  ;;  %v787_v24 = vld [vmem:[%s2098_s19] sm:$0xff]  ;;  %v1164_v47 = vld [vmem:[%s2118_s2 + $0x18] sm:$0xff]  ;;  %v1163_v48 = vld [vmem:[%s2118_s2 + $0x10] sm:$0xff]  ;;  %s1849_s30 = smov 100   ;;  %s1850_s20 = smov 124   ;;  %vm1012_vm8 = vcmask 64512  }
  0x5d   : > { %831 = vmatpush.msra.mxu1 %v816_v19  ;;  %v814_v25 = vld [vmem:[%s2103_s14] sm:$0xff]  ;;  %v1162_v49 = vld [vmem:[%s2118_s2 + $0x8] sm:$0xff]  ;;  %s2411_s9 = sld [smem:[#allocation19_spill]]  ;;  %vm1037_vm9 = vcmask 254976   ;;  %p1551_p9 = scmp.ne.s32.totalorder %s1825_s27, 1 }
  0x5e   : > { %855 = vmatpush.msra.mxu3 %v840_v20  ;;  %808 = vmatpush.msra.mxu0 %v788_v21  ;;  %v838_v26 = vld [vmem:[%s2108_s21] sm:$0xff]  ;;  %s2412_s28 = sld [smem:[#allocation23_spill]] }
  0x5f   : > { %v2132_v1 = vld [vmem:[#allocation2] sm:$0xff]  ;;  %832 = vmatpush.msra.mxu1 %v815_v22  ;;  %s2408_s10 = smov %s2407_s25  ;;  %v935_v27 = vld [vmem:[%s2407_s25 + $0x18] sm:$0xff]  ;;  %s2414_s13 = sld [smem:[#allocation24_spill]] }
  0x60   : > { %v754_v2 = vsel %vm753_vm1, %v2132_v1, 0.0  ;;  %v1672_v4 = vpop.eup %1671  ;;  %856 = vmatpush.msra.mxu3 %v839_v23  ;;  %809 = vmatpush.msra.mxu0 %v787_v24  ;;  %v934_v28 = vld [vmem:[%s2408_s10 + $0x10] sm:$0xff]  ;;  %v933_v30 = vld [vmem:[%s2408_s10 + $0x8] sm:$0xff]  ;;  %v2164_v38 = vld [vmem:[%s2092_s18] sm:$0x3f] }
  0x61   : > { %755 = vadd.xlane.f32.xlu0 %v754_v2  ;;  %v758_v5 = vmul.f32 32.0, %v1672_v4  ;;  %vm762_vm2 = vweird.f32 %v1672_v4  ;;  %833 = vmatpush.msra.mxu1 %v814_v25  ;;  %v783_v40 = vperm.slane %v2164_v38, 0  ;;  %v785_v43 = vperm.slane %v2164_v38, 1  ;;  %v932_v46 = vld [vmem:[%s2408_s10] sm:$0xff] }
  0x62   : > { %857 = vmatpush.msra.mxu3 %v838_v26  ;;  %v1161_v50 = vld [vmem:[%s2118_s2] sm:$0xff]  ;;  %s1848_s2 = smov 28  }
  0x63   : > { %v759_v6 = vsub.f32 1.0, %v758_v5  ;;  %v863_v52 = vld [vmem:[%s2409_s24] sm:$0xff] }
  0x64   : > { %951 = vmatpush.msrb.mxu3 %v935_v27  ;;  %874 = vrot.lane.b32.xlu2 %v863_v52, %s1847_s5  ;;  %v864_v53 = vld [vmem:[%s2410_s12] sm:$0xff]  ;;  %s2413_s14 = smov %s2412_s28 }
  0x65   : > { %v760_v7 = vmul.f32 %v1672_v4, %v759_v6  ;;  %v2206_v23 = vld [vmem:[%s2411_s9] sm:$0xff] }
  0x66   : > { %952 = vmatpush.msrb.mxu3 %v934_v28 }
  0x67   : > { %v761_v8 = vadd.f32 %v1672_v4, %v760_v7 }
  0x68   : > { %953 = vmatpush.msrb.mxu3 %v933_v30 }
  0x69   : > { %v2136_v9 = vsel %vm762_vm2, %v1672_v4, %v761_v8 }
  0x6a   : > { %954 = vmatpush.msrb.mxu3 %v932_v46 }
  0x6c   : > { %884 = vrot.lane.b32.xlu2 %v864_v53, %s1848_s2 }
  0xbe   : > { %v2193_v16 = vpop.permute.xlu2 %874 }
  0xc6   : > { %v2195_v17 = vpop.permute.xlu2 %884 }
  0xd4   : > { %v756_v10 = vpop.xlane.xlu0 %755 }
  0xd5   : > { %v764_v11 = vmul.f32 %v2136_v9, %v756_v10 }
  0xd7   : > { %v765_v12 = vsub.f32 %v2132_v1, %v764_v11 }
  0xd9   : > { %v766_v13 = vmul.f32 %v765_v12, %v765_v12 }
  0xdb   : > { %v767_v14 = vsel %vm753_vm1, %v766_v13, 0.0 }
  0xdc   : > { %768 = vadd.xlane.f32.xlu0 %v767_v14 }
 0x14f   : > { %v769_v29 = vpop.xlane.xlu0 %768 }
 0x150   : > { %v770_v31 = vmul.f32 %v769_v29, %v2136_v9 }
 0x152   : > { %v771_v32 = vadd.f32 1e-05, %v770_v31 }
 0x154   : > { %1673 = vrsqrt.f32 %v771_v32  ;;  %vm778_vm4 = vweird.f32 %v771_v32 }
 0x15a   : > { %v1674_v33 = vpop.eup %1673 }
 0x15b   : > { %v773_v34 = vmul.f32 %v1674_v33, %v771_v32  ;;  %vm779_vm3 = vweird.f32 %v1674_v33  ;;  %v1049_v32 = vld [vmem:[%s2412_s28 + $0x18] sm:$0xff] }
 0x15c   : > { %vm780_vm5 = vmor %vm778_vm4, %vm779_vm3  ;;  %1065 = vmatpush.msrb.mxu1 %v1049_v32 }
 0x15d   : > { %v774_v35 = vmul.f32 %v1674_v33, %v773_v34  ;;  %v1047_v34 = vld [vmem:[%s2413_s14 + $0x8] sm:$0xff] }
 0x15f   : > { %v775_v36 = vmul.f32 0.5, %v774_v35  ;;  %v1046_v35 = vld [vmem:[%s2413_s14] sm:$0xff] }
 0x161   : > { %v776_v37 = vsub.f32 1.5, %v775_v36 }
 0x163   : > { %v777_v39 = vmul.f32 %v1674_v33, %v776_v37 }
 0x165   : > { %v781_v41 = vsel %vm780_vm5, %v1674_v33, %v777_v39  ;;  %v1048_v33 = vld [vmem:[%s2413_s14 + $0x10] sm:$0xff] }
 0x166   : > { %v782_v42 = vmul.f32 %v781_v41, %v765_v12  ;;  %1066 = vmatpush.msrb.mxu1 %v1048_v33  ;;  %v2232_v41 = vld [vmem:[%s2414_s13] sm:$0x3] }
 0x168   : > { %v784_v44 = vmul.f32 %v783_v40, %v782_v42  ;;  %1067 = vmatpush.msrb.mxu1 %v1047_v34 }
 0x16a   : > { %v786_v45 = vadd.f32 %v785_v43, %v784_v44  ;;  %1068 = vmatpush.msrb.mxu1 %v1046_v35 }
 0x16c   : > { %1541 = vmatmul.msk.f32.vlgmr.msra.gmra.mxu0 %vm753_vm1, %v786_v45  ;;  %1542 = vmatmul.msk.f32.vlgmr.msra.gmra.mxu1 %vm753_vm1, %v786_v45 }
 0x16d   : > { %1543 = vmatmul.msk.f32.vlgmr.msra.gmra.mxu3 %vm753_vm1, %v786_v45 }
 0x16e   : > { %1177 = vmatpush.msra.mxu3 %v1164_v47 }
 0x170   : > { %1178 = vmatpush.msra.mxu3 %v1163_v48 }
 0x172   : > { %1179 = vmatpush.msra.mxu3 %v1162_v49 }
 0x174   : > { %1180 = vmatpush.msra.mxu3 %v1161_v50 }
 0x1e9   : > { %v811_v51 = vpop.f32.mrf.mxu0  ;;  %v835_v22 = vpop.f32.mrf.mxu1 }
 0x1ea   : > { %866 = vrot.lane.b32.xlu1 %v811_v51, %s1846_s17  ;;  %1544 = vmatmul.msk.f32.vlgmr.msrb.gmra.mxu3 %vm753_vm1, %v811_v51  ;;  %v872_v24 = vmul.f32 %v2206_v23, %v811_v51  ;;  %v899_v52 = vmul.f32 %v2206_v23, %v835_v22 }
 0x1f0   : > { %v2189_v56 = vpop.f32.mrf.mxu3 }
 0x1f2   : > { %1548 = vmatmul.msk.f32.vlgmr.msra.gmra.mxu3 %vm753_vm1, %v811_v51 }
 0x25c   : > { %v867_v54 = vpop.permute.xlu1 %866 }
 0x25d   : > { %v868_v55 = vsel %vm865_vm6, %v867_v54, %v811_v51 }
 0x25e   : > { %869 = vrot.lane.b32.xlu1 %v868_v55, %s1846_s17 }
 0x26d   : > { %v956_v57 = vpop.f32.mrf.mxu3 }
 0x26e   : > { %v959_v58 = vmul.f32 0.25, %v956_v57 }
 0x270   : > { %v961_v59 = vsel %vm960_vm7, %v959_v58, -inf }
 0x271   : > { %v962_v60 = vrot.slane %v961_v59, 4 }
 0x273   : > { %v963_v61 = vmax.f32 %v961_v59, %v962_v60 }
 0x275   : > { %v964_v62 = vrot.slane %v963_v61, 2 }
 0x277   : > { %v965_v63 = vmax.f32 %v963_v61, %v964_v62 }
 0x279   : > { %v966_v0 = vrot.slane %v965_v63, 1 }
 0x27b   : > { %v967_v2 = vmax.f32 %v965_v63, %v966_v0 }
 0x27d   : > { %v968_v3 = vsub.f32 %v959_v58, %v967_v2 }
 0x27f   : > { %v969_v4 = vmul.f32 1.442695, %v968_v3 }
 0x281   : > { %1675 = vpow2.f32 %v969_v4 }
 0x287   : > { %v1676_v5 = vpop.eup %1675 }
 0x288   : > { %v971_v6 = vsel %vm960_vm7, %v1676_v5, 0.0 }
 0x289   : > { %v972_v7 = vrot.slane %v971_v6, 4 }
 0x28b   : > { %v973_v8 = vadd.f32 %v972_v7, %v971_v6 }
 0x28d   : > { %v974_v10 = vrot.slane %v973_v8, 2 }
 0x28f   : > { %v975_v11 = vadd.f32 %v974_v10, %v973_v8 }
 0x291   : > { %v976_v12 = vrot.slane %v975_v11, 1 }
 0x293   : > { %v977_v13 = vadd.f32 %v976_v12, %v975_v11 }
 0x295   : > { %1677 = vrcp.f32 %v977_v13 }
 0x29b   : > { %v1678_v14 = vpop.eup %1677 }
 0x29c   : > { %v979_v15 = vmul.f32 %v1678_v14, %v1676_v5 }
 0x29e   : > { %980 = vxpose.xlu2.b32.start.end [1/1] (short) (narrow) %v979_v15, 8 }
 0x2d0   : > { %v870_v18 = vpop.permute.xlu1 %869 }
 0x2d1   : > { %v871_v19 = vsel %vm865_vm6, %v870_v18, %v811_v51 }
 0x2d2   : > { %v877_v20 = vmul.f32 %v2193_v16, %v871_v19  ;;  %v887_v21 = vmul.f32 %v2195_v17, %v871_v19 }
 0x2d4   : > { %889 = vrot.lane.b32.xlu1 %v887_v21, %s1849_s30  ;;  %879 = vrot.lane.b32.xlu0 %v877_v20, %s1850_s20 }
 0x2dc   : > { %893 = vrot.lane.b32.xlu1 %v835_v22, %s1846_s17 }
 0x337   : > { %v996_v28 = vpop.trf.xlu2 }
 0x346   : > { %v890_v25 = vpop.permute.xlu1 %889  ;;  %v880_v26 = vpop.permute.xlu0 %879 }
 0x347   : > { %v882_v27 = vadd.f32 %v880_v26, %v872_v24 }
 0x349   : > { %v892_v29 = vadd.f32 %v890_v25, %v882_v27  ;;  %v1160_v27 = vld [vmem:[%s2113_s16 + $0x18] sm:$0xff] }
 0x34b   : > { %1031 = vmatpush.msrb.mxu0 %v892_v29  ;;  %v1158_v29 = vld [vmem:[%s2113_s16 + $0x8] sm:$0xff] }
 0x34c   : > { %1545 = vmatmul.msk.f32.vlgmr.msrb.gmra.mxu0 %vm1012_vm8, %v996_v28  ;;  %v1159_v28 = vld [vmem:[%s2113_s16 + $0x10] sm:$0xff] }
 0x34e   : > { %v894_v30 = vpop.permute.xlu1 %893 }
 0x34f   : > { %v895_v31 = vsel %vm865_vm6, %v894_v30, %v835_v22  ;;  %v1157_v30 = vld [vmem:[%s2113_s16] sm:$0xff] }
 0x350   : > { %896 = vrot.lane.b32.xlu1 %v895_v31, %s1846_s17 }
 0x3c2   : > { %v897_v36 = vpop.permute.xlu1 %896 }
 0x3c3   : > { %v898_v37 = vsel %vm865_vm6, %v897_v36, %v835_v22  ;;  %v918_v36 = vmul.f32 %v2206_v23, %v2189_v56 }
 0x3c4   : > { %v900_v39 = vmul.f32 %v898_v37, %v2193_v16  ;;  %v906_v40 = vmul.f32 %v898_v37, %v2195_v17 }
 0x3c6   : > { %908 = vrot.lane.b32.xlu1 %v906_v40, %s1849_s30  ;;  %902 = vrot.lane.b32.xlu0 %v900_v39, %s1850_s20 }
 0x3c9   : > { %v1033_v42 = vpop.f32.mrf.mxu0 }
 0x3ca   : > { %v1036_v43 = vmul.f32 %v1033_v42, %v2232_v41 }
 0x3cc   : > { %v1038_v44 = vsel %vm1037_vm9, %v1036_v43, 0.0 }
 0x3cd   : > { %v1039_v45 = vrot.slane %v1038_v44, 4 }
 0x3ce   : > { %912 = vrot.lane.b32.xlu1 %v2189_v56, %s1846_s17 }
 0x3cf   : > { %v1040_v46 = vadd.f32 %v1039_v45, %v1038_v44 }
 0x3d1   : > { %v1041_v47 = vrot.slane %v1040_v46, 2 }
 0x3d3   : > { %v1042_v48 = vadd.f32 %v1041_v47, %v1040_v46  ;;  %v1182_v46 = vpop.f32.mrf.mxu3 }
 0x3d5   : > { %v1043_v49 = vrot.slane %v1042_v48, 1 }
 0x3d7   : > { %v1044_v50 = vadd.f32 %v1043_v49, %v1042_v48 }
 0x3d9   : > { %v1045_v51 = vmul.f32 %v1044_v50, %v835_v22 }
 0x3db   : > { %1546 = vmatmul.msk.f32.vlgmr.msrb.gmra.mxu1 %vm753_vm1, %v1045_v51 }
 0x438   : > { %v909_v53 = vpop.permute.xlu1 %908  ;;  %v903_v54 = vpop.permute.xlu0 %902 }
 0x439   : > { %v905_v55 = vadd.f32 %v903_v54, %v899_v52 }
 0x43b   : > { %v911_v57 = vadd.f32 %v909_v53, %v905_v55  ;;  %v1240_v55 = vld [vmem:[%s2072_s3 + $0x18] sm:$0xff] }
 0x43c   : > { %1260 = vmatpush.msra.mxu1 %v1240_v55 }
 0x43d   : > { %1143 = vmatpush.msra.mxu0 %v911_v57  ;;  %v1238_v57 = vld [vmem:[%s2072_s3 + $0x8] sm:$0xff] }
 0x43f   : > { %1200 = vmatpush.msrb.mxu0 %v1160_v27  ;;  %v1279_v27 = vld [vmem:[%s2124_s4 + $0x10] sm:$0xff] }
 0x440   : > { %v913_v58 = vpop.permute.xlu1 %912 }
 0x441   : > { %v914_v59 = vsel %vm865_vm6, %v913_v58, %v2189_v56  ;;  %1201 = vmatpush.msrb.mxu0 %v1159_v28  ;;  %v1237_v58 = vld [vmem:[%s2072_s3] sm:$0xff]  ;;  %v1278_v28 = vld [vmem:[%s2124_s4 + $0x8] sm:$0xff] }
 0x442   : > { %915 = vrot.lane.b32.xlu2 %v914_v59, %s1846_s17  ;;  %v1292_v59 = vld [vmem:[%s2124_s4 + $0x78] sm:$0xff]  ;;  %s2415_s17 = scalar_lea.vmem %s2346_s8, %s2081_s6 }
 0x443   : > { %1202 = vmatpush.msrb.mxu0 %v1158_v29  ;;  %1293 = vmatpush.msra.mxu2 %v1292_v59  ;;  %v1277_v29 = vld [vmem:[%s2124_s4] sm:$0xff] }
 0x445   : > { %1203 = vmatpush.msrb.mxu0 %v1157_v30  ;;  %v1670_v30 = vld [vmem:[%s2415_s17] ss:$0 sm:$0xff] }
 0x458   : > { %v1070_v60 = vpop.f32.mrf.mxu1 }
 0x459   : > { %v1073_v61 = vmul.f32 0.25, %v1070_v60  ;;  %v1291_v60 = vld [vmem:[%s2124_s4 + $0x70] sm:$0xff] }
 0x45a   : > { %1294 = vmatpush.msra.mxu2 %v1291_v60 }
 0x45b   : > { %v1074_v62 = vsel %vm960_vm7, %v1073_v61, -inf }
 0x45c   : > { %v1075_v63 = vrot.slane %v1074_v62, 4 }
 0x45e   : > { %v1076_v0 = vmax.f32 %v1074_v62, %v1075_v63 }
 0x460   : > { %v1077_v2 = vrot.slane %v1076_v0, 2 }
 0x462   : > { %v1078_v3 = vmax.f32 %v1076_v0, %v1077_v2  ;;  %v1289_v0 = vld [vmem:[%s2124_s4 + $0x60] sm:$0xff] }
 0x464   : > { %v1079_v4 = vrot.slane %v1078_v3, 1 }
 0x466   : > { %v1080_v5 = vmax.f32 %v1078_v3, %v1079_v4 }
 0x468   : > { %v1081_v6 = vsub.f32 %v1073_v61, %v1080_v5  ;;  %v1290_v61 = vld [vmem:[%s2124_s4 + $0x68] sm:$0xff] }
 0x469   : > { %1295 = vmatpush.msra.mxu2 %v1290_v61 }
 0x46a   : > { %v1082_v7 = vmul.f32 1.442695, %v1081_v6 }
 0x46b   : > { %1296 = vmatpush.msra.mxu2 %v1289_v0 }
 0x46c   : > { %1679 = vpow2.f32 %v1082_v7 }
 0x472   : > { %v1680_v8 = vpop.eup %1679 }
 0x473   : > { %v1084_v10 = vsel %vm960_vm7, %v1680_v8, 0.0 }
 0x474   : > { %v1085_v11 = vrot.slane %v1084_v10, 4 }
 0x476   : > { %v1086_v12 = vadd.f32 %v1085_v11, %v1084_v10 }
 0x478   : > { %v1087_v13 = vrot.slane %v1086_v12, 2 }
 0x47a   : > { %v1088_v14 = vadd.f32 %v1087_v13, %v1086_v12  ;;  %v1235_v12 = vperm.slane %v2164_v38, 3 }
 0x47c   : > { %v1089_v15 = vrot.slane %v1088_v14, 1 }
 0x47e   : > { %v1090_v18 = vadd.f32 %v1089_v15, %v1088_v14  ;;  %v1288_v15 = vld [vmem:[%s2124_s4 + $0x58] sm:$0xff] }
 0x47f   : > { %1297 = vmatpush.msra.mxu2 %v1288_v15 }
 0x480   : > { %1681 = vrcp.f32 %v1090_v18  ;;  %v1287_v18 = vld [vmem:[%s2124_s4 + $0x50] sm:$0xff] }
 0x481   : > { %1298 = vmatpush.msra.mxu2 %v1287_v18 }
 0x486   : > { %v1682_v19 = vpop.eup %1681 }
 0x487   : > { %v1092_v20 = vmul.f32 %v1682_v19, %v1680_v8  ;;  %v1286_v19 = vld [vmem:[%s2124_s4 + $0x48] sm:$0xff] }
 0x488   : > { %1299 = vmatpush.msra.mxu2 %v1286_v19 }
 0x489   : > { %1093 = vxpose.xlu0.b32.start.end [1/1] (short) (narrow) %v1092_v20, 8  ;;  %v1285_v20 = vld [vmem:[%s2124_s4 + $0x40] sm:$0xff] }
 0x48a   : > { %1300 = vmatpush.msra.mxu2 %v1285_v20 }
 0x49c   : > { %v916_v21 = vpop.permute.xlu2 %915 }
 0x49d   : > { %v917_v22 = vsel %vm865_vm6, %v916_v21, %v2189_v56  ;;  %v1284_v21 = vld [vmem:[%s2124_s4 + $0x38] sm:$0xff] }
 0x49e   : > { %v919_v24 = vmul.f32 %v917_v22, %v2193_v16  ;;  %v925_v25 = vmul.f32 %v917_v22, %v2195_v17  ;;  %v1283_v22 = vld [vmem:[%s2124_s4 + $0x30] sm:$0xff]  ;;  %1301 = vmatpush.msra.mxu2 %v1284_v21 }
 0x4a0   : > { %921 = vrot.lane.b32.xlu1 %v919_v24, %s1850_s20  ;;  %v1282_v24 = vld [vmem:[%s2124_s4 + $0x28] sm:$0xff]  ;;  %1302 = vmatpush.msra.mxu2 %v1283_v22 }
 0x4a2   : > { %1303 = vmatpush.msra.mxu2 %v1282_v24 }
 0x4a8   : > { %927 = vrot.lane.b32.xlu1 %v925_v25, %s1849_s30  ;;  %v1281_v25 = vld [vmem:[%s2124_s4 + $0x20] sm:$0xff] }
 0x4a9   : > { %1304 = vmatpush.msra.mxu2 %v1281_v25 }
 0x512   : > { %v922_v32 = vpop.permute.xlu1 %921 }
 0x513   : > { %v924_v40 = vadd.f32 %v922_v32, %v918_v36 }
 0x51a   : > { %v928_v39 = vpop.permute.xlu1 %927 }
 0x51b   : > { %v930_v43 = vadd.f32 %v928_v39, %v924_v40 }
 0x52d   : > { %v1109_v26 = vpop.trf.xlu0 }
 0x52e   : > { %1547 = vmatmul.msk.f32.vlgmr.msra.gmra.mxu0 %vm1012_vm8, %v1109_v26  ;;  %v1280_v26 = vld [vmem:[%s2124_s4 + $0x18] sm:$0xff] }
 0x52f   : > { %1305 = vmatpush.msra.mxu2 %v1280_v26 }
 0x531   : > { %1306 = vmatpush.msra.mxu2 %v1279_v27 }
 0x533   : > { %1307 = vmatpush.msra.mxu2 %v1278_v28 }
 0x535   : > { %1308 = vmatpush.msra.mxu2 %v1277_v29 }
 0x5ab   : > { %v1145_v31 = vpop.f32.mrf.mxu0 }
 0x5ac   : > { %v1148_v16 = vmul.f32 %v1145_v31, %v2232_v41  ;;  %v1208_v41 = vperm.slane %v2164_v38, 4 }
 0x5ae   : > { %v1149_v33 = vsel %vm1037_vm9, %v1148_v16, 0.0 }
 0x5af   : > { %v1150_v17 = vrot.slane %v1149_v33, 4 }
 0x5b1   : > { %v1151_v34 = vadd.f32 %v1150_v17, %v1149_v33 }
 0x5b3   : > { %v1152_v35 = vrot.slane %v1151_v34, 2 }
 0x5b5   : > { %v1153_v37 = vadd.f32 %v1152_v35, %v1151_v34 }
 0x5b7   : > { %v1154_v42 = vrot.slane %v1153_v37, 1 }
 0x5b9   : > { %v1155_v44 = vadd.f32 %v1154_v42, %v1153_v37  ;;  %v1314_v42 = vperm.slane %v2164_v38, 5 }
 0x5bb   : > { %v1156_v45 = vmul.f32 %v1155_v44, %v930_v43 }
 0x5bd   : > { %1549 = vmatmul.msk.f32.vlgmr.msrb.gmra.mxu0 %vm753_vm1, %v1156_v45 }
 0x63a   : > { %v1205_v47 = vpop.f32.mrf.mxu0 }
 0x63b   : > { %v1206_v48 = vadd.f32 %v1205_v47, %v1182_v46 }
 0x63d   : > { %v1209_v49 = vadd.f32 %v1208_v41, %v1206_v48 }
 0x63f   : > { %v2263_v56 = vadd.f32 %v1209_v49, %v2132_v1  ;;  %v1239_v1 = vld [vmem:[%s2072_s3 + $0x10] sm:$0xff] }
 0x640   : > { %1261 = vmatpush.msra.mxu1 %v1239_v1 }
 0x641   : > { %v1211_v23 = vsel %vm753_vm1, %v2263_v56, 0.0 }
 0x642   : > { %1212 = vadd.xlane.f32.xlu1 %v1211_v23  ;;  %1262 = vmatpush.msra.mxu1 %v1238_v57 }
 0x644   : > { %1263 = vmatpush.msra.mxu1 %v1237_v58 }
 0x6b5   : > { %v1213_v50 = vpop.xlane.xlu1 %1212 }
 0x6b6   : > { %v1214_v51 = vmul.f32 %v1213_v50, %v2136_v9 }
 0x6b8   : > { %v1215_v52 = vsub.f32 %v2263_v56, %v1214_v51 }
 0x6ba   : > { %v1216_v53 = vmul.f32 %v1215_v52, %v1215_v52 }
 0x6bc   : > { %v1217_v54 = vsel %vm753_vm1, %v1216_v53, 0.0 }
 0x6bd   : > { %1218 = vadd.xlane.f32.xlu0 %v1217_v54 }
 0x730   : > { %v1219_v62 = vpop.xlane.xlu0 %1218 }
 0x731   : > { %v1220_v63 = vmul.f32 %v1219_v62, %v2136_v9  ;;  %v1233_v9 = vperm.slane %v2164_v38, 2 }
 0x733   : > { %v1221_v2 = vadd.f32 1e-05, %v1220_v63 }
 0x735   : > { %1683 = vrsqrt.f32 %v1221_v2  ;;  %vm1228_vm11 = vweird.f32 %v1221_v2 }
 0x73b   : > { %v1684_v3 = vpop.eup %1683 }
 0x73c   : > { %v1223_v4 = vmul.f32 %v1684_v3, %v1221_v2  ;;  %vm1229_vm10 = vweird.f32 %v1684_v3 }
 0x73d   : > { %vm1230_vm12 = vmor %vm1228_vm11, %vm1229_vm10 }
 0x73e   : > { %v1224_v5 = vmul.f32 %v1684_v3, %v1223_v4 }
 0x740   : > { %v1225_v6 = vmul.f32 0.5, %v1224_v5 }
 0x742   : > { %v1226_v7 = vsub.f32 1.5, %v1225_v6 }
 0x744   : > { %v1227_v8 = vmul.f32 %v1684_v3, %v1226_v7 }
 0x746   : > { %v1231_v10 = vsel %vm1230_vm12, %v1684_v3, %v1227_v8 }
 0x747   : > { %v1232_v11 = vmul.f32 %v1231_v10, %v1215_v52 }
 0x749   : > { %v1234_v13 = vmul.f32 %v1233_v9, %v1232_v11 }
 0x74b   : > { %v1236_v14 = vadd.f32 %v1235_v12, %v1234_v13 }
 0x74d   : > { %1550 = vmatmul.msk.f32.vlgmr.msra.gmra.mxu1 %vm753_vm1, %v1236_v14 }
 0x7ca   : > { %v1265_v31 = vpop.f32.mrf.mxu1 }
 0x7cb   : > { %v1266_v32 = vadd.f32 %v1670_v30, %v1265_v31 }
 0x7cd   : > { %v1269_v16 = vmul.f32 0.044715, %v1266_v32  ;;  %v1268_v37 = vmul.f32 0.5, %v1266_v32 }
 0x7cf   : > { %v1270_v33 = vmul.f32 %v1269_v16, %v1266_v32 }
 0x7d1   : > { %v1271_v17 = vmul.f32 %v1270_v33, %v1266_v32 }
 0x7d3   : > { %v1272_v34 = vadd.f32 %v1271_v17, %v1266_v32 }
 0x7d5   : > { %v1273_v35 = vmul.f32 0.7978846, %v1272_v34 }
 0x7d7   : > { %1685 = vtanh.f32 %v1273_v35 }
 0x7dd   : > { %v1686_v36 = vpop.eup %1685 }
 0x7de   : > { %v1275_v39 = vadd.f32 1.0, %v1686_v36 }
 0x7e0   : > { %v1276_v40 = vmul.f32 %v1275_v39, %v1268_v37 }
 0x7e2   : > { %1309 = vmatmul.f32.vlgmr.msra.gmra.mxu2 %v1276_v40 }
 0x865   : > { %v1310_v43 = vpop.f32.mrf.mxu2 }
 0x866   : > { %v1313_v44 = vadd.f32 %v1310_v43, %v2263_v56  ;;  %1320 = sbr.rel (%p1551_p9) target bundleno = 2156 (0x86c), region = 100 }
 0x868   : > { %v1315_v45 = vadd.f32 %v1314_v42, %v1313_v44 }
 0x86a   : > { %1316 = vst.msk [vmem:[#allocation2] sm:$0xff] %vm753_vm1, %v1315_v45 }
 0x86b   : > { %1321 = vst.msk [vmem:[%s2129_s11] sm:$0xff] %vm753_vm1, %v1315_v45 }
 0x86c PF: > { %s2416_s6 = sld [smem:[#allocation13_spill]]  ;;  %s2425_s21 = smov %s1805_s22 }
 0x86d   : > { %s2417_s4 = sld [smem:[#allocation16_spill]]  ;;  %s2426_s22 = smov %s1809_s23 }
 0x86e   : > { %s2418_s24 = sld [smem:[#allocation9_spill]] }
 0x86f   : > { %s2419_s25 = sld [smem:[#allocation10_spill]] }
 0x870   : > { %s2420_s26 = sld [smem:[#allocation17_spill]] }
 0x871   : > { %s2421_s27 = sld [smem:[#allocation11_spill]] }
 0x872   : > { %s32_s0 = sadd.s32 1, %s2416_s6   ;;  %s2422_s28 = sld [smem:[#allocation12_spill]] }
 0x873   : > { %p29_p10 = scmp.ge.s32.totalorder %s32_s0, 6   ;;  %s2423_s29 = sld [smem:[#allocation14_spill]] }
 0x874   : > { %s2424_s30 = sld [smem:[#allocation15_spill]]  ;;  %s2427_s23 = smov %s2417_s4 }
 0x875   :  { %31 = sbr.rel (!%p29_p10) target bundleno = 26 (0x1a), region = 169 }
 0x87a   :  { %1341 = vsyncpa [#allocation4], 1 }
 0x87b   :  { %1343 = vsyncpa [#allocation4 + $0x1], 1 }
 0x87c   :  { %1344 = vsyncpa [#allocation6], 1 }
 0x87d   :  { %1346 = vsyncpa [#allocation6 + $0x1], 1 }

</bundles_post_ra>
